<compile_context>
chip_gen: v7x
topology: tpu7x:2x2x1
jax: 0.10.0
libtpu: 0.0.40
codegen_flags: <defaults>
</compile_context>

<pallas_src>
import functools

import jax
import jax.numpy as jnp
import numpy as np
from jax.experimental import pallas as pl
from jax.experimental.pallas import tpu as pltpu

_UNROLL_STEPS = 8  # full static unroll only for short recurrences


# --------------------------------------------------------------------------
# Pallas kernel: full TreeLSTM recurrence for one batch block.
# --------------------------------------------------------------------------
def _nary_tree_lstm_kernel(iou_x_ref, fx_x_ref, idd_ref, idr_ref, idl_ref,
                           frl_ref, fd_ref, whcat_ref, h_ref, c_ref):
    n_steps, _, Bb, S = idd_ref.shape          # ids: (n_steps, 1, B_blk, S_pad)
    H = fx_x_ref.shape[2]
    H3 = 3 * H
    BS = Bb * S
    mm = whcat_ref.dtype                       # MXU operand dtype (bf16 / f32)

    # Step-invariant operands, resident in VMEM/vregs for the whole recurrence.
    iou_x = iou_x_ref[...].reshape(BS, H3)                 # (BS, 3H) f32
    fx_x_mm = fx_x_ref[...].reshape(BS, H).astype(mm)      # (BS, H)
    w_hcat = whcat_ref[...]                                # (H, 8H) fused weights

    one_mm = jnp.ones((), dtype=mm)
    zero_mm = jnp.zeros((), dtype=mm)
    col3 = jax.lax.broadcasted_iota(jnp.int32, (1, 1, 3 * BS), 2)
    row_iota = jax.lax.broadcasted_iota(jnp.int32, (BS, 1), 0)
    node_iota = jax.lax.broadcasted_iota(jnp.int32, (Bb, S, 1), 1).reshape(BS, 1)
    nonzero_node = node_iota != 0                          # node index != 0

    def step(t, carry):
        h, c = carry

        # Flat (batch-offset-folded) node ids for this tree level.
        fd2 = idd_ref[t][0]                                # (Bb, S)  dest ids
        fr2 = idr_ref[t][0]
        fl2 = idl_ref[t][0]
        frl_row = frl_ref[t][0]                            # (1, 2BS) [r | l] src ids
        fd_row = fd_ref[t][0]                              # (1, BS)  d src ids

        # Fused gather one-hot G_cat (BS, 3BS); column blocks [d | r | l].
        # Built in one compare->select pass directly in the MXU dtype.
        tgt = jnp.where(col3 < BS, fd2[:, :, None],
                        jnp.where(col3 < 2 * BS, fr2[:, :, None] + BS,
                                  fl2[:, :, None] + 2 * BS))
        g_cat = jnp.where(tgt == col3, one_mm, zero_mm).reshape(BS, 3 * BS)

        # Scatter-oriented one-hots built directly transposed (row = dest
        # node, column = source row) -> plain jnp.dot, no XLU transpose.
        gt_rl = jnp.where(row_iota == frl_row, one_mm, zero_mm)        # (BS, 2BS)
        gt_d = jnp.where(row_iota == fd_row, 1.0, 0.0)                 # (BS, BS) f32

        # All four recurrent projections in one fused MXU matmul.
        h_all = jnp.dot(h.astype(mm), w_hcat,
                        preferred_element_type=jnp.float32)            # (BS, 8H)
        iou_hr = h_all[:, :H3]
        iou_hl = h_all[:, H3:2 * H3]
        fh_r = h_all[:, 2 * H3:2 * H3 + H]                 # h @ (w_fh0 + w_fh1)
        fh_l = h_all[:, 2 * H3 + H:]                       # h @ (w_fh2 + w_fh3)

        # iou scatter-adds fused into a single K=2BS matmul (duplicate indices
        # accumulate exactly in the f32 MXU accumulator).
        v_rl = jnp.concatenate([iou_hr.astype(mm), iou_hl.astype(mm)], axis=0)
        iou = iou_x + jnp.dot(gt_rl, v_rl, preferred_element_type=jnp.float32)
        i_g = jax.nn.sigmoid(iou[:, :H])
        o_g = jax.nn.sigmoid(iou[:, H:2 * H])
        u_g = jnp.tanh(iou[:, 2 * H:])

        # f gathers fused into a single K=3BS matmul.
        v_g = jnp.concatenate([fx_x_mm, fh_r.astype(mm), fh_l.astype(mm)], axis=0)
        f = jax.nn.sigmoid(jnp.dot(g_cat, v_g, preferred_element_type=jnp.float32))
        fc = f * c

        # Cell-state scatter stays f32: an exact permutation-sum, so bf16
        # rounding never compounds through the c/h recurrence.
        c_new = i_g * u_g + jnp.dot(gt_d, fc, preferred_element_type=jnp.float32)
        h_new = o_g * jnp.tanh(c_new)

        # Child counts = lane row-sum of the exact one-hot (replaces N=1 matmul).
        counts = jnp.sum(gt_d, axis=1, keepdims=True)
        updated = (counts > 0.0) & nonzero_node
        h = jnp.where(updated, h_new, h)
        c = jnp.where(updated, c_new, c)
        return h, c

    h = jnp.zeros((BS, H), jnp.float32)
    c = jnp.zeros((BS, H), jnp.float32)
    if n_steps <= _UNROLL_STEPS:
        for t in range(n_steps):                 # small trees: full static unroll
            h, c = step(t, (h, c))
    else:                                        # long trees: bounded live ranges
        h, c = jax.lax.fori_loop(0, n_steps, step, (h, c), unroll=2)

    # Single final store per block (S padded to a multiple of 8 -> layout-free).
    h_ref[...] = h.reshape(Bb, S, H)
    c_ref[...] = c.reshape(Bb, S, H)


# --------------------------------------------------------------------------
# Batch-block selection: BS = B_blk * S_pad targets one MXU contraction tile.
# --------------------------------------------------------------------------
def _choose_batch_blocks(B, S_pad, target_bs):
    b_blk = 1
    for cand in range(1, B + 1):
        if B % cand == 0 and cand * S_pad <= max(target_bs, S_pad):
            b_blk = cand
    nb = B // b_blk
    # Keep >= 2 grid blocks when possible so v7x's 2 TensorCores both get work.
    if nb == 1 and B % 2 == 0 and B >= 2:
        nb = 2
    return nb


# --------------------------------------------------------------------------
# Wrapper: glue (embedding lookup, hoisted x-projections, weight fusion,
# id flattening, root extraction) + pallas_call.
# --------------------------------------------------------------------------
@functools.partial(jax.jit,
                   static_argnames=("mxu_dtype", "num_batch_blocks",
                                    "target_block_nodes"))
def nary_tree_forward(params, input_ids, tree_ids, tree_ids_r, tree_ids_l, *,
                      mxu_dtype=jnp.bfloat16, num_batch_blocks=None,
                      target_block_nodes=256):
    # Embedding lookup is plain-JAX glue (pure table gather).
    embeds = jnp.take(params["embedding"], input_ids, axis=0)        # (B, S, E)
    B, S, _ = embeds.shape
    H = params["w_fx"].shape[1]
    n_steps = tree_ids.shape[1]

    # Step-invariant input projections hoisted out of the recurrence.
    iou_x = (jnp.einsum("bse,ek->bsk", embeds, params["w_ioux"])
             + params["b_ioux"]).astype(jnp.float32)                 # (B, S, 3H)
    fx_x = (jnp.einsum("bse,ek->bsk", embeds, params["w_fx"])
            + params["b_fx"]).astype(jnp.float32)                    # (B, S, H)

    # Pre-sum the fh pairs and fuse all recurrent weights into one matrix.
    w_hcat = jnp.concatenate(
        [params["w_iouh_r"], params["w_iouh_l"],
         params["w_fh0"] + params["w_fh1"],
         params["w_fh2"] + params["w_fh3"]], axis=1).astype(mxu_dtype)  # (H, 8H)

    # Pad the node axis to a sublane multiple so all in-kernel reshapes are free.
    S_pad = ((S + 7) // 8) * 8
    pad_s = S_pad - S
    if pad_s:
        iou_x = jnp.pad(iou_x, ((0, 0), (0, pad_s), (0, 0)))
        fx_x = jnp.pad(fx_x, ((0, 0), (0, pad_s), (0, 0)))

    def _pad_ids(ids):
        ids = ids.astype(jnp.int32)
        if pad_s:  # padded slots point at node 0 (excluded from updates)
            ids = jnp.pad(ids, ((0, 0), (0, 0), (0, pad_s)))
        return ids

    ids_d, ids_r, ids_l = map(_pad_ids, (tree_ids, tree_ids_r, tree_ids_l))

    nb = (_choose_batch_blocks(B, S_pad, target_block_nodes)
          if num_batch_blocks is None else num_batch_blocks)
    assert B % nb == 0
    B_blk = B // nb
    BS = B_blk * S_pad

    # ids -> (n_steps, nb, B_blk, S_pad) with the local batch offset folded in,
    # so every index is already a flat node id inside its batch block.
    offs = (jnp.arange(B_blk, dtype=jnp.int32) * S_pad)[None, None, :, None]

    def _prep(ids):
        return (jnp.transpose(ids, (1, 0, 2))
                .reshape(n_steps, nb, B_blk, S_pad) + offs)

    flat_d, flat_r, flat_l = map(_prep, (ids_d, ids_r, ids_l))

    # Lane-vector (scatter-oriented) forms: [r | l] fused for the iou scatter,
    # d alone for the exact cell-state scatter.
    frl_row = jnp.concatenate([flat_r.reshape(n_steps, nb, 1, BS),
                               flat_l.reshape(n_steps, nb, 1, BS)], axis=-1)
    fd_row = flat_d.reshape(n_steps, nb, 1, BS)

    # ---- honest VMEM accounting (padded to (8,128) tiles) -------------------
    mm_b = jnp.dtype(mxu_dtype).itemsize

    def _rup(x, m):
        return ((x + m - 1) // m) * m

    H_l, H3_l, H8_l = _rup(H, 128), _rup(3 * H, 128), _rup(8 * H, 128)
    BS_l, BS2_l, BS3_l = _rup(BS, 128), _rup(2 * BS, 128), _rup(3 * BS, 128)
    io_bytes = 2 * (                                      # double-buffered block I/O
        BS * (H3_l + H_l) * 4                             # iou_x / fx_x blocks
        + 3 * n_steps * _rup(B_blk, 8) * _rup(S_pad, 128) * 4   # gather-form ids
        + n_steps * 8 * (BS2_l + BS_l) * 4                # scatter-form ids
        + _rup(H, 8) * H8_l * mm_b                        # fused recurrent weights
        + 2 * BS * H_l * 4)                               # h / c output blocks
    step_bytes = (                                        # per-step live values
        BS * BS3_l * (4 + mm_b)                           # fused-gather target + one-hot
        + BS * BS2_l * mm_b + BS * BS_l * 4               # gt_rl (mm) + gt_d (f32)
        + BS * H8_l * 4                                   # h_all
        + (2 * BS * H3_l + 3 * BS * H_l) * mm_b           # stacked matmul RHS copies
        + BS * H3_l * 4                                   # iou
        + 12 * BS * H_l * 4)                              # gates, f, fc, old/new h,c
    vmem_limit = int(min(max(io_bytes + 2 * step_bytes, 32 << 20), 48 << 20))

    grid_spec = pltpu.PrefetchScalarGridSpec(
        num_scalar_prefetch=0,
        grid=(nb,),
        in_specs=[
            pl.BlockSpec((B_blk, S_pad, 3 * H), lambda b: (b, 0, 0)),      # iou_x
            pl.BlockSpec((B_blk, S_pad, H), lambda b: (b, 0, 0)),          # fx_x
            pl.BlockSpec((n_steps, 1, B_blk, S_pad), lambda b: (0, b, 0, 0)),  # flat_d
            pl.BlockSpec((n_steps, 1, B_blk, S_pad), lambda b: (0, b, 0, 0)),  # flat_r
            pl.BlockSpec((n_steps, 1, B_blk, S_pad), lambda b: (0, b, 0, 0)),  # flat_l
            pl.BlockSpec((n_steps, 1, 1, 2 * BS), lambda b: (0, b, 0, 0)),     # frl_row
            pl.BlockSpec((n_steps, 1, 1, BS), lambda b: (0, b, 0, 0)),         # fd_row
            pl.BlockSpec((H, 8 * H), lambda b: (0, 0)),                    # fused W
        ],
        out_specs=(
            pl.BlockSpec((B_blk, S_pad, H), lambda b: (b, 0, 0)),          # h
            pl.BlockSpec((B_blk, S_pad, H), lambda b: (b, 0, 0)),          # c
        ),
    )

    h_pad, c_pad = pl.pallas_call(
        _nary_tree_lstm_kernel,
        out_shape=(
            jax.ShapeDtypeStruct((B, S_pad, H), jnp.float32),
            jax.ShapeDtypeStruct((B, S_pad, H), jnp.float32),
        ),
        grid_spec=grid_spec,
        compiler_params=pltpu.CompilerParams(
            dimension_semantics=("parallel",),
            vmem_limit_bytes=vmem_limit),
    )(iou_x, fx_x, flat_d, flat_r, flat_l, frl_row, fd_row, w_hcat)

    h = h_pad[:, :S, :]
    c = c_pad[:, :S, :]

    # Root extraction (plain-JAX glue), mirrors TreeLSTM.forward.
    roots = jnp.max(tree_ids[:, -1, :], axis=1)
    h_root = h[jnp.arange(B), roots, :]
    return (h, c), h_root


# --------------------------------------------------------------------------
# Deterministic parameter initialization (xavier weights, zero biases).
# --------------------------------------------------------------------------
def _xavier(key, shape):
    fan_out, fan_in = shape[0], shape[1]
    limit = (6.0 / (fan_in + fan_out)) ** 0.5
    return jax.random.uniform(key, shape, jnp.float32, -limit, limit)


def init_params(key, vocab_size, E, H):
    ks = jax.random.split(key, 10)
    return {
        "embedding": _xavier(ks[0], (vocab_size, E)),
        # torch Linear weights are (out, in); store transposed (in, out).
        "w_ioux": _xavier(ks[1], (3 * H, E)).T,
        "b_ioux": jnp.zeros((1, 3 * H), jnp.float32),
        "w_iouh_r": _xavier(ks[2], (3 * H, H)).T,
        "w_iouh_l": _xavier(ks[3], (3 * H, H)).T,
        "w_fx": _xavier(ks[4], (H, E)).T,
        "b_fx": jnp.zeros((1, H), jnp.float32),
        "w_fh0": _xavier(ks[5], (H, H)).T,
        "w_fh1": _xavier(ks[6], (H, H)).T,
        "w_fh2": _xavier(ks[7], (H, H)).T,
        "w_fh3": _xavier(ks[8], (H, H)).T,
    }


# --------------------------------------------------------------------------
# Pure-JAX reference (mirrors the PyTorch cell semantics) for a sanity check.
# --------------------------------------------------------------------------
def _reference_forward(params, input_ids, tree_ids, tree_ids_r, tree_ids_l):
    x = jnp.take(params["embedding"], input_ids, axis=0)
    B, S, _ = x.shape
    H = params["w_fx"].shape[1]
    n_steps = tree_ids.shape[1]
    h = jnp.zeros((B, S, H), jnp.float32)
    c = jnp.zeros((B, S, H), jnp.float32)
    b_idx = jnp.arange(B)[:, None]

    for step in range(n_steps):
        idx_d = tree_ids[:, step, :]
        idx_r = tree_ids_r[:, step, :]
        idx_l = tree_ids_l[:, step, :]

        iou = x @ params["w_ioux"] + params["b_ioux"]
        iou = iou.at[b_idx, idx_r].add(h @ params["w_iouh_r"])
        iou = iou.at[b_idx, idx_l].add(h @ params["w_iouh_l"])
        i_g, o_g, u_g = jnp.split(iou, 3, axis=-1)
        i_g, o_g, u_g = jax.nn.sigmoid(i_g), jax.nn.sigmoid(o_g), jnp.tanh(u_g)

        fx = x @ params["w_fx"] + params["b_fx"]
        fh_r = h @ params["w_fh0"] + h @ params["w_fh1"]
        fh_l = h @ params["w_fh2"] + h @ params["w_fh3"]
        f = jax.nn.sigmoid(fx[b_idx, idx_d] + fh_r[b_idx, idx_r] + fh_l[b_idx, idx_l])
        fc = f * c

        c_new = (i_g * u_g).at[b_idx, idx_d].add(fc)
        h_new = o_g * jnp.tanh(c_new)

        counts = jnp.zeros((B, S), jnp.int32).at[b_idx, idx_d].add(1)
        updated = ((counts > 0) & (jnp.arange(S)[None, :] != 0))[..., None]
        h = jnp.where(updated, h_new, h)
        c = jnp.where(updated, c_new, c)

    roots = jnp.max(tree_ids[:, -1, :], axis=1)
    h_root = h[jnp.arange(B), roots, :]
    return (h, c), h_root


# --------------------------------------------------------------------------
if __name__ == "__main__":
    B, S, E, H, V, n_steps = 2, 8, 16, 32, 50, 4

    root = jax.random.PRNGKey(0)
    k_param, k_ids, k_d, k_r, k_l = jax.random.split(root, 5)

    params = init_params(k_param, V, E, H)
    input_ids = jax.random.randint(k_ids, (B, S), 0, V, dtype=jnp.int32)
    tree_ids = jax.random.randint(k_d, (B, n_steps, S), 0, S, dtype=jnp.int32)
    tree_ids_r = jax.random.randint(k_r, (B, n_steps, S), 0, S, dtype=jnp.int32)
    tree_ids_l = jax.random.randint(k_l, (B, n_steps, S), 0, S, dtype=jnp.int32)

    (h_exp, c_exp), h_root_exp = _reference_forward(
        params, input_ids, tree_ids, tree_ids_r, tree_ids_l)

    # f32-MXU path: matches the f32 reference up to reassociation rounding.
    (h32, c32), hroot32 = nary_tree_forward(
        params, input_ids, tree_ids, tree_ids_r, tree_ids_l,
        mxu_dtype=jnp.float32)
    jax.block_until_ready((h32, c32, hroot32))
    np.testing.assert_allclose(np.asarray(h32), np.asarray(h_exp), rtol=2e-3, atol=2e-3)
    np.testing.assert_allclose(np.asarray(c32), np.asarray(c_exp), rtol=2e-3, atol=2e-3)
    np.testing.assert_allclose(np.asarray(hroot32), np.asarray(h_root_exp),
                               rtol=2e-3, atol=2e-3)

    # Default bf16-MXU path (f32 accumulation, f32 gate math, f32 exact fc
    # scatter): looser tolerance covers bf16 operand rounding in the gates.
    (hbf, cbf), hrootbf = nary_tree_forward(
        params, input_ids, tree_ids, tree_ids_r, tree_ids_l)
    jax.block_until_ready((hbf, cbf, hrootbf))
    np.testing.assert_allclose(np.asarray(hbf), np.asarray(h_exp), rtol=2e-2, atol=2e-2)
    np.testing.assert_allclose(np.asarray(cbf), np.asarray(c_exp), rtol=2e-2, atol=2e-2)
    np.testing.assert_allclose(np.asarray(hrootbf), np.asarray(h_root_exp),
                               rtol=2e-2, atol=2e-2)

    print("KERNEL_OK")
</pallas_src>

<mosaic_0001>
module attributes {stable_mosaic.version = 11 : i64} {
  func.func @_nary_tree_lstm_kernel(%arg0: i32, %arg1: memref<1x8x96xf32, #tpu.memory_space<vmem>>, %arg2: memref<1x8x32xf32, #tpu.memory_space<vmem>>, %arg3: memref<4x1x1x8xi32, #tpu.memory_space<vmem>>, %arg4: memref<4x1x1x8xi32, #tpu.memory_space<vmem>>, %arg5: memref<4x1x1x8xi32, #tpu.memory_space<vmem>>, %arg6: memref<4x1x1x16xi32, #tpu.memory_space<vmem>>, %arg7: memref<4x1x1x8xi32, #tpu.memory_space<vmem>>, %arg8: memref<32x256xf32, #tpu.memory_space<vmem>>, %arg9: memref<1x8x32xf32, #tpu.memory_space<vmem>>, %arg10: memref<1x8x32xf32, #tpu.memory_space<vmem>>) attributes {dimension_semantics = [#tpu.dimension_semantics<parallel>], iteration_bounds = array<i64: 2>, scalar_prefetch = 0 : i64, scratch_operands = 0 : i64, tpu.core_type = #tpu.core_type<tc>, window_params = [{transform_indices = @transform_0, window_bounds = array<i64: 1, 8, 96>}, {transform_indices = @transform_1, window_bounds = array<i64: 1, 8, 32>}, {transform_indices = @transform_2, window_bounds = array<i64: 4, 1, 1, 8>}, {transform_indices = @transform_3, window_bounds = array<i64: 4, 1, 1, 8>}, {transform_indices = @transform_4, window_bounds = array<i64: 4, 1, 1, 8>}, {transform_indices = @transform_5, window_bounds = array<i64: 4, 1, 1, 16>}, {transform_indices = @transform_6, window_bounds = array<i64: 4, 1, 1, 8>}, {pipeline_mode = #tpu.pipeline_mode<synchronous>, transform_indices = @transform_7, window_bounds = array<i64: 32, 256>}, {transform_indices = @transform_8, window_bounds = array<i64: 1, 8, 32>}, {transform_indices = @transform_9, window_bounds = array<i64: 1, 8, 32>}]} {
    %c0 = arith.constant 0 : index
    %c0_0 = arith.constant 0 : index
    %c0_1 = arith.constant 0 : index
    %0 = vector.load %arg1[%c0, %c0_0, %c0_1] : memref<1x8x96xf32, #tpu.memory_space<vmem>>, vector<1x8x96xf32>
    %1 = vector.shape_cast %0 : vector<1x8x96xf32> to vector<8x96xf32>
    %c0_2 = arith.constant 0 : index
    %c0_3 = arith.constant 0 : index
    %c0_4 = arith.constant 0 : index
    %2 = vector.load %arg2[%c0_2, %c0_3, %c0_4] : memref<1x8x32xf32, #tpu.memory_space<vmem>>, vector<1x8x32xf32>
    %3 = vector.shape_cast %2 : vector<1x8x32xf32> to vector<8x32xf32>
    %c0_5 = arith.constant 0 : index
    %c0_6 = arith.constant 0 : index
    %4 = vector.load %arg8[%c0_5, %c0_6] : memref<32x256xf32, #tpu.memory_space<vmem>>, vector<32x256xf32>
    %5 = tpu.iota {dimensions = array<i32: 2>} : vector<1x1x24xi32>
    %6 = tpu.iota {dimensions = array<i32: 0>} : vector<8x1xi32>
    %7 = tpu.iota {dimensions = array<i32: 1>} : vector<1x8x1xi32>
    %8 = vector.shape_cast %7 : vector<1x8x1xi32> to vector<8x1xi32>
    %c0_i32 = arith.constant 0 : i32
    %9 = vector.broadcast %c0_i32 : i32 to vector<8x1xi32>
    %10 = arith.cmpi ne, %8, %9 : vector<8x1xi32>
    %cst = arith.constant 0.000000e+00 : f32
    %11 = vector.broadcast %cst : f32 to vector<8x32xf32>
    %cst_7 = arith.constant 0.000000e+00 : f32
    %12 = vector.broadcast %cst_7 : f32 to vector<8x32xf32>
    %c0_8 = arith.constant 0 : index
    %c0_9 = arith.constant 0 : index
    %c0_10 = arith.constant 0 : index
    %c0_11 = arith.constant 0 : index
    %13 = vector.load %arg3[%c0_8, %c0_9, %c0_10, %c0_11] : memref<4x1x1x8xi32, #tpu.memory_space<vmem>>, vector<1x1x1x8xi32>
    %14 = vector.shape_cast %13 : vector<1x1x1x8xi32> to vector<1x1x8xi32>
    %15 = vector.shape_cast %14 : vector<1x1x8xi32> to vector<1x8xi32>
    %c0_12 = arith.constant 0 : index
    %c0_13 = arith.constant 0 : index
    %c0_14 = arith.constant 0 : index
    %c0_15 = arith.constant 0 : index
    %16 = vector.load %arg4[%c0_12, %c0_13, %c0_14, %c0_15] : memref<4x1x1x8xi32, #tpu.memory_space<vmem>>, vector<1x1x1x8xi32>
    %17 = vector.shape_cast %16 : vector<1x1x1x8xi32> to vector<1x1x8xi32>
    %18 = vector.shape_cast %17 : vector<1x1x8xi32> to vector<1x8xi32>
    %c0_16 = arith.constant 0 : index
    %c0_17 = arith.constant 0 : index
    %c0_18 = arith.constant 0 : index
    %c0_19 = arith.constant 0 : index
    %19 = vector.load %arg5[%c0_16, %c0_17, %c0_18, %c0_19] : memref<4x1x1x8xi32, #tpu.memory_space<vmem>>, vector<1x1x1x8xi32>
    %20 = vector.shape_cast %19 : vector<1x1x1x8xi32> to vector<1x1x8xi32>
    %21 = vector.shape_cast %20 : vector<1x1x8xi32> to vector<1x8xi32>
    %c0_20 = arith.constant 0 : index
    %c0_21 = arith.constant 0 : index
    %c0_22 = arith.constant 0 : index
    %c0_23 = arith.constant 0 : index
    %22 = vector.load %arg6[%c0_20, %c0_21, %c0_22, %c0_23] : memref<4x1x1x16xi32, #tpu.memory_space<vmem>>, vector<1x1x1x16xi32>
    %23 = vector.shape_cast %22 : vector<1x1x1x16xi32> to vector<1x1x16xi32>
    %24 = vector.shape_cast %23 : vector<1x1x16xi32> to vector<1x16xi32>
    %c0_24 = arith.constant 0 : index
    %c0_25 = arith.constant 0 : index
    %c0_26 = arith.constant 0 : index
    %c0_27 = arith.constant 0 : index
    %25 = vector.load %arg7[%c0_24, %c0_25, %c0_26, %c0_27] : memref<4x1x1x8xi32, #tpu.memory_space<vmem>>, vector<1x1x1x8xi32>
    %26 = vector.shape_cast %25 : vector<1x1x1x8xi32> to vector<1x1x8xi32>
    %27 = vector.shape_cast %26 : vector<1x1x8xi32> to vector<1x8xi32>
    %c8_i32 = arith.constant 8 : i32
    %28 = vector.broadcast %c8_i32 : i32 to vector<1x1x24xi32>
    %29 = arith.cmpi slt, %5, %28 : vector<1x1x24xi32>
    %30 = vector.shape_cast %15 : vector<1x8xi32> to vector<1x8x1xi32>
    %c16_i32 = arith.constant 16 : i32
    %31 = vector.broadcast %c16_i32 : i32 to vector<1x1x24xi32>
    %32 = arith.cmpi slt, %5, %31 : vector<1x1x24xi32>
    %33 = vector.shape_cast %18 : vector<1x8xi32> to vector<1x8x1xi32>
    %c8_i32_28 = arith.constant 8 : i32
    %34 = vector.broadcast %c8_i32_28 : i32 to vector<1x8x1xi32>
    %35 = arith.addi %33, %34 : vector<1x8x1xi32>
    %36 = vector.shape_cast %21 : vector<1x8xi32> to vector<1x8x1xi32>
    %c16_i32_29 = arith.constant 16 : i32
    %37 = vector.broadcast %c16_i32_29 : i32 to vector<1x8x1xi32>
    %38 = arith.addi %36, %37 : vector<1x8x1xi32>
    %39 = vector.shape_cast %32 : vector<1x1x24xi1> to vector<1x1x24xi1>
    %40 = vector.broadcast %39 : vector<1x1x24xi1> to vector<1x8x24xi1>
    %41 = vector.shape_cast %35 : vector<1x8x1xi32> to vector<1x8x1xi32>
    %42 = vector.broadcast %41 : vector<1x8x1xi32> to vector<1x8x24xi32>
    %43 = vector.shape_cast %38 : vector<1x8x1xi32> to vector<1x8x1xi32>
    %44 = vector.broadcast %43 : vector<1x8x1xi32> to vector<1x8x24xi32>
    %45 = arith.select %40, %42, %44 : vector<1x8x24xi1>, vector<1x8x24xi32>
    %46 = vector.shape_cast %29 : vector<1x1x24xi1> to vector<1x1x24xi1>
    %47 = vector.broadcast %46 : vector<1x1x24xi1> to vector<1x8x24xi1>
    %48 = vector.shape_cast %30 : vector<1x8x1xi32> to vector<1x8x1xi32>
    %49 = vector.broadcast %48 : vector<1x8x1xi32> to vector<1x8x24xi32>
    %50 = arith.select %47, %49, %45 : vector<1x8x24xi1>, vector<1x8x24xi32>
    %51 = vector.broadcast %5 : vector<1x1x24xi32> to vector<1x8x24xi32>
    %52 = arith.cmpi eq, %50, %51 : vector<1x8x24xi32>
    %cst_30 = arith.constant 1.000000e+00 : f32
    %cst_31 = arith.constant 0.000000e+00 : f32
    %53 = vector.broadcast %cst_30 : f32 to vector<1x8x24xf32>
    %54 = vector.broadcast %cst_31 : f32 to vector<1x8x24xf32>
    %55 = arith.select %52, %53, %54 : vector<1x8x24xi1>, vector<1x8x24xf32>
    %56 = vector.shape_cast %55 : vector<1x8x24xf32> to vector<8x24xf32>
    %57 = vector.broadcast %6 : vector<8x1xi32> to vector<8x16xi32>
    %58 = vector.broadcast %24 : vector<1x16xi32> to vector<8x16xi32>
    %59 = arith.cmpi eq, %57, %58 : vector<8x16xi32>
    %cst_32 = arith.constant 1.000000e+00 : f32
    %cst_33 = arith.constant 0.000000e+00 : f32
    %60 = vector.broadcast %cst_32 : f32 to vector<8x16xf32>
    %61 = vector.broadcast %cst_33 : f32 to vector<8x16xf32>
    %62 = arith.select %59, %60, %61 : vector<8x16xi1>, vector<8x16xf32>
    %63 = vector.broadcast %6 : vector<8x1xi32> to vector<8x8xi32>
    %64 = vector.broadcast %27 : vector<1x8xi32> to vector<8x8xi32>
    %65 = arith.cmpi eq, %63, %64 : vector<8x8xi32>
    %cst_34 = arith.constant 1.000000e+00 : f32
    %cst_35 = arith.constant 0.000000e+00 : f32
    %66 = vector.broadcast %cst_34 : f32 to vector<8x8xf32>
    %67 = vector.broadcast %cst_35 : f32 to vector<8x8xf32>
    %68 = arith.select %65, %66, %67 : vector<8x8xi1>, vector<8x8xf32>
    %cst_36 = arith.constant dense<0.000000e+00> : vector<8x256xf32>
    %69 = tpu.matmul %11, %4, %cst_36 {dimension_numbers = #tpu.dot_dimension_numbers<[1], [0], [0], [1], [0, 0, 1, 1], [], []>} : vector<8x32xf32>, vector<32x256xf32>, vector<8x256xf32> -> vector<8x256xf32>
    %70 = vector.extract_strided_slice %69 {offsets = [0, 0], sizes = [8, 96], strides = [1, 1]} : vector<8x256xf32> to vector<8x96xf32>
    %71 = vector.extract_strided_slice %69 {offsets = [0, 96], sizes = [8, 96], strides = [1, 1]} : vector<8x256xf32> to vector<8x96xf32>
    %72 = vector.extract_strided_slice %69 {offsets = [0, 192], sizes = [8, 32], strides = [1, 1]} : vector<8x256xf32> to vector<8x32xf32>
    %73 = vector.extract_strided_slice %69 {offsets = [0, 224], sizes = [8, 32], strides = [1, 1]} : vector<8x256xf32> to vector<8x32xf32>
    %74 = tpu.concatenate %70, %71 in 0 : vector<8x96xf32>, vector<8x96xf32> -> vector<16x96xf32>
    %cst_37 = arith.constant dense<0.000000e+00> : vector<8x96xf32>
    %75 = tpu.matmul %62, %74, %cst_37 {dimension_numbers = #tpu.dot_dimension_numbers<[1], [0], [0], [1], [0, 0, 1, 1], [], []>} : vector<8x16xf32>, vector<16x96xf32>, vector<8x96xf32> -> vector<8x96xf32>
    %76 = arith.addf %1, %75 : vector<8x96xf32>
    %77 = vector.extract_strided_slice %76 {offsets = [0, 0], sizes = [8, 32], strides = [1, 1]} : vector<8x96xf32> to vector<8x32xf32>
    %78 = arith.negf %77 : vector<8x32xf32>
    %79 = math.exp %78 : vector<8x32xf32>
    %cst_38 = arith.constant 1.000000e+00 : f32
    %80 = vector.broadcast %cst_38 : f32 to vector<8x32xf32>
    %81 = arith.addf %80, %79 : vector<8x32xf32>
    %82 = arith.divf %80, %81 : vector<8x32xf32>
    %83 = vector.extract_strided_slice %76 {offsets = [0, 32], sizes = [8, 32], strides = [1, 1]} : vector<8x96xf32> to vector<8x32xf32>
    %84 = arith.negf %83 : vector<8x32xf32>
    %85 = math.exp %84 : vector<8x32xf32>
    %cst_39 = arith.constant 1.000000e+00 : f32
    %86 = vector.broadcast %cst_39 : f32 to vector<8x32xf32>
    %87 = arith.addf %86, %85 : vector<8x32xf32>
    %88 = arith.divf %86, %87 : vector<8x32xf32>
    %89 = vector.extract_strided_slice %76 {offsets = [0, 64], sizes = [8, 32], strides = [1, 1]} : vector<8x96xf32> to vector<8x32xf32>
    %90 = math.tanh %89 : vector<8x32xf32>
    %91 = tpu.concatenate %3, %72, %73 in 0 : vector<8x32xf32>, vector<8x32xf32>, vector<8x32xf32> -> vector<24x32xf32>
    %cst_40 = arith.constant dense<0.000000e+00> : vector<8x32xf32>
    %92 = tpu.matmul %56, %91, %cst_40 {dimension_numbers = #tpu.dot_dimension_numbers<[1], [0], [0], [1], [0, 0, 1, 1], [], []>} : vector<8x24xf32>, vector<24x32xf32>, vector<8x32xf32> -> vector<8x32xf32>
    %93 = arith.negf %92 : vector<8x32xf32>
    %94 = math.exp %93 : vector<8x32xf32>
    %cst_41 = arith.constant 1.000000e+00 : f32
    %95 = vector.broadcast %cst_41 : f32 to vector<8x32xf32>
    %96 = arith.addf %95, %94 : vector<8x32xf32>
    %97 = arith.divf %95, %96 : vector<8x32xf32>
    %98 = arith.mulf %97, %12 : vector<8x32xf32>
    %99 = arith.mulf %82, %90 : vector<8x32xf32>
    %cst_42 = arith.constant dense<0.000000e+00> : vector<8x32xf32>
    %100 = tpu.matmul %68, %98, %cst_42 {dimension_numbers = #tpu.dot_dimension_numbers<[1], [0], [0], [1], [0, 0, 1, 1], [], []>} : vector<8x8xf32>, vector<8x32xf32>, vector<8x32xf32> -> vector<8x32xf32>
    %101 = arith.addf %99, %100 : vector<8x32xf32>
    %102 = math.tanh %101 : vector<8x32xf32>
    %103 = arith.mulf %88, %102 : vector<8x32xf32>
    %cst_43 = arith.constant dense<0.000000e+00> : vector<8xf32>
    %104 = vector.multi_reduction <add>, %68, %cst_43 [1] : vector<8x8xf32> to vector<8xf32>
    %105 = vector.shape_cast %104 : vector<8xf32> to vector<8x1xf32>
    %cst_44 = arith.constant 0.000000e+00 : f32
    %106 = vector.broadcast %cst_44 : f32 to vector<8x1xf32>
    %107 = arith.cmpf ogt, %105, %106 : vector<8x1xf32>
    %108 = arith.andi %107, %10 : vector<8x1xi1>
    %109 = vector.shape_cast %108 : vector<8x1xi1> to vector<8x1xi1>
    %110 = vector.broadcast %109 : vector<8x1xi1> to vector<8x32xi1>
    %111 = arith.select %110, %103, %11 : vector<8x32xi1>, vector<8x32xf32>
    %112 = vector.shape_cast %108 : vector<8x1xi1> to vector<8x1xi1>
    %113 = vector.broadcast %112 : vector<8x1xi1> to vector<8x32xi1>
    %114 = arith.select %113, %101, %12 : vector<8x32xi1>, vector<8x32xf32>
    %c1 = arith.constant 1 : index
    %c0_45 = arith.constant 0 : index
    %c0_46 = arith.constant 0 : index
    %c0_47 = arith.constant 0 : index
    %115 = vector.load %arg3[%c1, %c0_45, %c0_46, %c0_47] : memref<4x1x1x8xi32, #tpu.memory_space<vmem>>, vector<1x1x1x8xi32>
    %116 = vector.shape_cast %115 : vector<1x1x1x8xi32> to vector<1x1x8xi32>
    %117 = vector.shape_cast %116 : vector<1x1x8xi32> to vector<1x8xi32>
    %c1_48 = arith.constant 1 : index
    %c0_49 = arith.constant 0 : index
    %c0_50 = arith.constant 0 : index
    %c0_51 = arith.constant 0 : index
    %118 = vector.load %arg4[%c1_48, %c0_49, %c0_50, %c0_51] : memref<4x1x1x8xi32, #tpu.memory_space<vmem>>, vector<1x1x1x8xi32>
    %119 = vector.shape_cast %118 : vector<1x1x1x8xi32> to vector<1x1x8xi32>
    %120 = vector.shape_cast %119 : vector<1x1x8xi32> to vector<1x8xi32>
    %c1_52 = arith.constant 1 : index
    %c0_53 = arith.constant 0 : index
    %c0_54 = arith.constant 0 : index
    %c0_55 = arith.constant 0 : index
    %121 = vector.load %arg5[%c1_52, %c0_53, %c0_54, %c0_55] : memref<4x1x1x8xi32, #tpu.memory_space<vmem>>, vector<1x1x1x8xi32>
    %122 = vector.shape_cast %121 : vector<1x1x1x8xi32> to vector<1x1x8xi32>
    %123 = vector.shape_cast %122 : vector<1x1x8xi32> to vector<1x8xi32>
    %c1_56 = arith.constant 1 : index
    %c0_57 = arith.constant 0 : index
    %c0_58 = arith.constant 0 : index
    %c0_59 = arith.constant 0 : index
    %124 = vector.load %arg6[%c1_56, %c0_57, %c0_58, %c0_59] : memref<4x1x1x16xi32, #tpu.memory_space<vmem>>, vector<1x1x1x16xi32>
    %125 = vector.shape_cast %124 : vector<1x1x1x16xi32> to vector<1x1x16xi32>
    %126 = vector.shape_cast %125 : vector<1x1x16xi32> to vector<1x16xi32>
    %c1_60 = arith.constant 1 : index
    %c0_61 = arith.constant 0 : index
    %c0_62 = arith.constant 0 : index
    %c0_63 = arith.constant 0 : index
    %127 = vector.load %arg7[%c1_60, %c0_61, %c0_62, %c0_63] : memref<4x1x1x8xi32, #tpu.memory_space<vmem>>, vector<1x1x1x8xi32>
    %128 = vector.shape_cast %127 : vector<1x1x1x8xi32> to vector<1x1x8xi32>
    %129 = vector.shape_cast %128 : vector<1x1x8xi32> to vector<1x8xi32>
    %c8_i32_64 = arith.constant 8 : i32
    %130 = vector.broadcast %c8_i32_64 : i32 to vector<1x1x24xi32>
    %131 = arith.cmpi slt, %5, %130 : vector<1x1x24xi32>
    %132 = vector.shape_cast %117 : vector<1x8xi32> to vector<1x8x1xi32>
    %c16_i32_65 = arith.constant 16 : i32
    %133 = vector.broadcast %c16_i32_65 : i32 to vector<1x1x24xi32>
    %134 = arith.cmpi slt, %5, %133 : vector<1x1x24xi32>
    %135 = vector.shape_cast %120 : vector<1x8xi32> to vector<1x8x1xi32>
    %c8_i32_66 = arith.constant 8 : i32
    %136 = vector.broadcast %c8_i32_66 : i32 to vector<1x8x1xi32>
    %137 = arith.addi %135, %136 : vector<1x8x1xi32>
    %138 = vector.shape_cast %123 : vector<1x8xi32> to vector<1x8x1xi32>
    %c16_i32_67 = arith.constant 16 : i32
    %139 = vector.broadcast %c16_i32_67 : i32 to vector<1x8x1xi32>
    %140 = arith.addi %138, %139 : vector<1x8x1xi32>
    %141 = vector.shape_cast %134 : vector<1x1x24xi1> to vector<1x1x24xi1>
    %142 = vector.broadcast %141 : vector<1x1x24xi1> to vector<1x8x24xi1>
    %143 = vector.shape_cast %137 : vector<1x8x1xi32> to vector<1x8x1xi32>
    %144 = vector.broadcast %143 : vector<1x8x1xi32> to vector<1x8x24xi32>
    %145 = vector.shape_cast %140 : vector<1x8x1xi32> to vector<1x8x1xi32>
    %146 = vector.broadcast %145 : vector<1x8x1xi32> to vector<1x8x24xi32>
    %147 = arith.select %142, %144, %146 : vector<1x8x24xi1>, vector<1x8x24xi32>
    %148 = vector.shape_cast %131 : vector<1x1x24xi1> to vector<1x1x24xi1>
    %149 = vector.broadcast %148 : vector<1x1x24xi1> to vector<1x8x24xi1>
    %150 = vector.shape_cast %132 : vector<1x8x1xi32> to vector<1x8x1xi32>
    %151 = vector.broadcast %150 : vector<1x8x1xi32> to vector<1x8x24xi32>
    %152 = arith.select %149, %151, %147 : vector<1x8x24xi1>, vector<1x8x24xi32>
    %153 = vector.broadcast %5 : vector<1x1x24xi32> to vector<1x8x24xi32>
    %154 = arith.cmpi eq, %152, %153 : vector<1x8x24xi32>
    %cst_68 = arith.constant 1.000000e+00 : f32
    %cst_69 = arith.constant 0.000000e+00 : f32
    %155 = vector.broadcast %cst_68 : f32 to vector<1x8x24xf32>
    %156 = vector.broadcast %cst_69 : f32 to vector<1x8x24xf32>
    %157 = arith.select %154, %155, %156 : vector<1x8x24xi1>, vector<1x8x24xf32>
    %158 = vector.shape_cast %157 : vector<1x8x24xf32> to vector<8x24xf32>
    %159 = vector.broadcast %6 : vector<8x1xi32> to vector<8x16xi32>
    %160 = vector.broadcast %126 : vector<1x16xi32> to vector<8x16xi32>
    %161 = arith.cmpi eq, %159, %160 : vector<8x16xi32>
    %cst_70 = arith.constant 1.000000e+00 : f32
    %cst_71 = arith.constant 0.000000e+00 : f32
    %162 = vector.broadcast %cst_70 : f32 to vector<8x16xf32>
    %163 = vector.broadcast %cst_71 : f32 to vector<8x16xf32>
    %164 = arith.select %161, %162, %163 : vector<8x16xi1>, vector<8x16xf32>
    %165 = vector.broadcast %6 : vector<8x1xi32> to vector<8x8xi32>
    %166 = vector.broadcast %129 : vector<1x8xi32> to vector<8x8xi32>
    %167 = arith.cmpi eq, %165, %166 : vector<8x8xi32>
    %cst_72 = arith.constant 1.000000e+00 : f32
    %cst_73 = arith.constant 0.000000e+00 : f32
    %168 = vector.broadcast %cst_72 : f32 to vector<8x8xf32>
    %169 = vector.broadcast %cst_73 : f32 to vector<8x8xf32>
    %170 = arith.select %167, %168, %169 : vector<8x8xi1>, vector<8x8xf32>
    %cst_74 = arith.constant dense<0.000000e+00> : vector<8x256xf32>
    %171 = tpu.matmul %111, %4, %cst_74 {dimension_numbers = #tpu.dot_dimension_numbers<[1], [0], [0], [1], [0, 0, 1, 1], [], []>} : vector<8x32xf32>, vector<32x256xf32>, vector<8x256xf32> -> vector<8x256xf32>
    %172 = vector.extract_strided_slice %171 {offsets = [0, 0], sizes = [8, 96], strides = [1, 1]} : vector<8x256xf32> to vector<8x96xf32>
    %173 = vector.extract_strided_slice %171 {offsets = [0, 96], sizes = [8, 96], strides = [1, 1]} : vector<8x256xf32> to vector<8x96xf32>
    %174 = vector.extract_strided_slice %171 {offsets = [0, 192], sizes = [8, 32], strides = [1, 1]} : vector<8x256xf32> to vector<8x32xf32>
    %175 = vector.extract_strided_slice %171 {offsets = [0, 224], sizes = [8, 32], strides = [1, 1]} : vector<8x256xf32> to vector<8x32xf32>
    %176 = tpu.concatenate %172, %173 in 0 : vector<8x96xf32>, vector<8x96xf32> -> vector<16x96xf32>
    %cst_75 = arith.constant dense<0.000000e+00> : vector<8x96xf32>
    %177 = tpu.matmul %164, %176, %cst_75 {dimension_numbers = #tpu.dot_dimension_numbers<[1], [0], [0], [1], [0, 0, 1, 1], [], []>} : vector<8x16xf32>, vector<16x96xf32>, vector<8x96xf32> -> vector<8x96xf32>
    %178 = arith.addf %1, %177 : vector<8x96xf32>
    %179 = vector.extract_strided_slice %178 {offsets = [0, 0], sizes = [8, 32], strides = [1, 1]} : vector<8x96xf32> to vector<8x32xf32>
    %180 = arith.negf %179 : vector<8x32xf32>
    %181 = math.exp %180 : vector<8x32xf32>
    %cst_76 = arith.constant 1.000000e+00 : f32
    %182 = vector.broadcast %cst_76 : f32 to vector<8x32xf32>
    %183 = arith.addf %182, %181 : vector<8x32xf32>
    %184 = arith.divf %182, %183 : vector<8x32xf32>
    %185 = vector.extract_strided_slice %178 {offsets = [0, 32], sizes = [8, 32], strides = [1, 1]} : vector<8x96xf32> to vector<8x32xf32>
    %186 = arith.negf %185 : vector<8x32xf32>
    %187 = math.exp %186 : vector<8x32xf32>
    %cst_77 = arith.constant 1.000000e+00 : f32
    %188 = vector.broadcast %cst_77 : f32 to vector<8x32xf32>
    %189 = arith.addf %188, %187 : vector<8x32xf32>
    %190 = arith.divf %188, %189 : vector<8x32xf32>
    %191 = vector.extract_strided_slice %178 {offsets = [0, 64], sizes = [8, 32], strides = [1, 1]} : vector<8x96xf32> to vector<8x32xf32>
    %192 = math.tanh %191 : vector<8x32xf32>
    %193 = tpu.concatenate %3, %174, %175 in 0 : vector<8x32xf32>, vector<8x32xf32>, vector<8x32xf32> -> vector<24x32xf32>
    %cst_78 = arith.constant dense<0.000000e+00> : vector<8x32xf32>
    %194 = tpu.matmul %158, %193, %cst_78 {dimension_numbers = #tpu.dot_dimension_numbers<[1], [0], [0], [1], [0, 0, 1, 1], [], []>} : vector<8x24xf32>, vector<24x32xf32>, vector<8x32xf32> -> vector<8x32xf32>
    %195 = arith.negf %194 : vector<8x32xf32>
    %196 = math.exp %195 : vector<8x32xf32>
    %cst_79 = arith.constant 1.000000e+00 : f32
    %197 = vector.broadcast %cst_79 : f32 to vector<8x32xf32>
    %198 = arith.addf %197, %196 : vector<8x32xf32>
    %199 = arith.divf %197, %198 : vector<8x32xf32>
    %200 = arith.mulf %199, %114 : vector<8x32xf32>
    %201 = arith.mulf %184, %192 : vector<8x32xf32>
    %cst_80 = arith.constant dense<0.000000e+00> : vector<8x32xf32>
    %202 = tpu.matmul %170, %200, %cst_80 {dimension_numbers = #tpu.dot_dimension_numbers<[1], [0], [0], [1], [0, 0, 1, 1], [], []>} : vector<8x8xf32>, vector<8x32xf32>, vector<8x32xf32> -> vector<8x32xf32>
    %203 = arith.addf %201, %202 : vector<8x32xf32>
    %204 = math.tanh %203 : vector<8x32xf32>
    %205 = arith.mulf %190, %204 : vector<8x32xf32>
    %cst_81 = arith.constant dense<0.000000e+00> : vector<8xf32>
    %206 = vector.multi_reduction <add>, %170, %cst_81 [1] : vector<8x8xf32> to vector<8xf32>
    %207 = vector.shape_cast %206 : vector<8xf32> to vector<8x1xf32>
    %cst_82 = arith.constant 0.000000e+00 : f32
    %208 = vector.broadcast %cst_82 : f32 to vector<8x1xf32>
    %209 = arith.cmpf ogt, %207, %208 : vector<8x1xf32>
    %210 = arith.andi %209, %10 : vector<8x1xi1>
    %211 = vector.shape_cast %210 : vector<8x1xi1> to vector<8x1xi1>
    %212 = vector.broadcast %211 : vector<8x1xi1> to vector<8x32xi1>
    %213 = arith.select %212, %205, %111 : vector<8x32xi1>, vector<8x32xf32>
    %214 = vector.shape_cast %210 : vector<8x1xi1> to vector<8x1xi1>
    %215 = vector.broadcast %214 : vector<8x1xi1> to vector<8x32xi1>
    %216 = arith.select %215, %203, %114 : vector<8x32xi1>, vector<8x32xf32>
    %c2 = arith.constant 2 : index
    %c0_83 = arith.constant 0 : index
    %c0_84 = arith.constant 0 : index
    %c0_85 = arith.constant 0 : index
    %217 = vector.load %arg3[%c2, %c0_83, %c0_84, %c0_85] : memref<4x1x1x8xi32, #tpu.memory_space<vmem>>, vector<1x1x1x8xi32>
    %218 = vector.shape_cast %217 : vector<1x1x1x8xi32> to vector<1x1x8xi32>
    %219 = vector.shape_cast %218 : vector<1x1x8xi32> to vector<1x8xi32>
    %c2_86 = arith.constant 2 : index
    %c0_87 = arith.constant 0 : index
    %c0_88 = arith.constant 0 : index
    %c0_89 = arith.constant 0 : index
    %220 = vector.load %arg4[%c2_86, %c0_87, %c0_88, %c0_89] : memref<4x1x1x8xi32, #tpu.memory_space<vmem>>, vector<1x1x1x8xi32>
    %221 = vector.shape_cast %220 : vector<1x1x1x8xi32> to vector<1x1x8xi32>
    %222 = vector.shape_cast %221 : vector<1x1x8xi32> to vector<1x8xi32>
    %c2_90 = arith.constant 2 : index
    %c0_91 = arith.constant 0 : index
    %c0_92 = arith.constant 0 : index
    %c0_93 = arith.constant 0 : index
    %223 = vector.load %arg5[%c2_90, %c0_91, %c0_92, %c0_93] : memref<4x1x1x8xi32, #tpu.memory_space<vmem>>, vector<1x1x1x8xi32>
    %224 = vector.shape_cast %223 : vector<1x1x1x8xi32> to vector<1x1x8xi32>
    %225 = vector.shape_cast %224 : vector<1x1x8xi32> to vector<1x8xi32>
    %c2_94 = arith.constant 2 : index
    %c0_95 = arith.constant 0 : index
    %c0_96 = arith.constant 0 : index
    %c0_97 = arith.constant 0 : index
    %226 = vector.load %arg6[%c2_94, %c0_95, %c0_96, %c0_97] : memref<4x1x1x16xi32, #tpu.memory_space<vmem>>, vector<1x1x1x16xi32>
    %227 = vector.shape_cast %226 : vector<1x1x1x16xi32> to vector<1x1x16xi32>
    %228 = vector.shape_cast %227 : vector<1x1x16xi32> to vector<1x16xi32>
    %c2_98 = arith.constant 2 : index
    %c0_99 = arith.constant 0 : index
    %c0_100 = arith.constant 0 : index
    %c0_101 = arith.constant 0 : index
    %229 = vector.load %arg7[%c2_98, %c0_99, %c0_100, %c0_101] : memref<4x1x1x8xi32, #tpu.memory_space<vmem>>, vector<1x1x1x8xi32>
    %230 = vector.shape_cast %229 : vector<1x1x1x8xi32> to vector<1x1x8xi32>
    %231 = vector.shape_cast %230 : vector<1x1x8xi32> to vector<1x8xi32>
    %c8_i32_102 = arith.constant 8 : i32
    %232 = vector.broadcast %c8_i32_102 : i32 to vector<1x1x24xi32>
    %233 = arith.cmpi slt, %5, %232 : vector<1x1x24xi32>
    %234 = vector.shape_cast %219 : vector<1x8xi32> to vector<1x8x1xi32>
    %c16_i32_103 = arith.constant 16 : i32
    %235 = vector.broadcast %c16_i32_103 : i32 to vector<1x1x24xi32>
    %236 = arith.cmpi slt, %5, %235 : vector<1x1x24xi32>
    %237 = vector.shape_cast %222 : vector<1x8xi32> to vector<1x8x1xi32>
    %c8_i32_104 = arith.constant 8 : i32
    %238 = vector.broadcast %c8_i32_104 : i32 to vector<1x8x1xi32>
    %239 = arith.addi %237, %238 : vector<1x8x1xi32>
    %240 = vector.shape_cast %225 : vector<1x8xi32> to vector<1x8x1xi32>
    %c16_i32_105 = arith.constant 16 : i32
    %241 = vector.broadcast %c16_i32_105 : i32 to vector<1x8x1xi32>
    %242 = arith.addi %240, %241 : vector<1x8x1xi32>
    %243 = vector.shape_cast %236 : vector<1x1x24xi1> to vector<1x1x24xi1>
    %244 = vector.broadcast %243 : vector<1x1x24xi1> to vector<1x8x24xi1>
    %245 = vector.shape_cast %239 : vector<1x8x1xi32> to vector<1x8x1xi32>
    %246 = vector.broadcast %245 : vector<1x8x1xi32> to vector<1x8x24xi32>
    %247 = vector.shape_cast %242 : vector<1x8x1xi32> to vector<1x8x1xi32>
    %248 = vector.broadcast %247 : vector<1x8x1xi32> to vector<1x8x24xi32>
    %249 = arith.select %244, %246, %248 : vector<1x8x24xi1>, vector<1x8x24xi32>
    %250 = vector.shape_cast %233 : vector<1x1x24xi1> to vector<1x1x24xi1>
    %251 = vector.broadcast %250 : vector<1x1x24xi1> to vector<1x8x24xi1>
    %252 = vector.shape_cast %234 : vector<1x8x1xi32> to vector<1x8x1xi32>
    %253 = vector.broadcast %252 : vector<1x8x1xi32> to vector<1x8x24xi32>
    %254 = arith.select %251, %253, %249 : vector<1x8x24xi1>, vector<1x8x24xi32>
    %255 = vector.broadcast %5 : vector<1x1x24xi32> to vector<1x8x24xi32>
    %256 = arith.cmpi eq, %254, %255 : vector<1x8x24xi32>
    %cst_106 = arith.constant 1.000000e+00 : f32
    %cst_107 = arith.constant 0.000000e+00 : f32
    %257 = vector.broadcast %cst_106 : f32 to vector<1x8x24xf32>
    %258 = vector.broadcast %cst_107 : f32 to vector<1x8x24xf32>
    %259 = arith.select %256, %257, %258 : vector<1x8x24xi1>, vector<1x8x24xf32>
    %260 = vector.shape_cast %259 : vector<1x8x24xf32> to vector<8x24xf32>
    %261 = vector.broadcast %6 : vector<8x1xi32> to vector<8x16xi32>
    %262 = vector.broadcast %228 : vector<1x16xi32> to vector<8x16xi32>
    %263 = arith.cmpi eq, %261, %262 : vector<8x16xi32>
    %cst_108 = arith.constant 1.000000e+00 : f32
    %cst_109 = arith.constant 0.000000e+00 : f32
    %264 = vector.broadcast %cst_108 : f32 to vector<8x16xf32>
    %265 = vector.broadcast %cst_109 : f32 to vector<8x16xf32>
    %266 = arith.select %263, %264, %265 : vector<8x16xi1>, vector<8x16xf32>
    %267 = vector.broadcast %6 : vector<8x1xi32> to vector<8x8xi32>
    %268 = vector.broadcast %231 : vector<1x8xi32> to vector<8x8xi32>
    %269 = arith.cmpi eq, %267, %268 : vector<8x8xi32>
    %cst_110 = arith.constant 1.000000e+00 : f32
    %cst_111 = arith.constant 0.000000e+00 : f32
    %270 = vector.broadcast %cst_110 : f32 to vector<8x8xf32>
    %271 = vector.broadcast %cst_111 : f32 to vector<8x8xf32>
    %272 = arith.select %269, %270, %271 : vector<8x8xi1>, vector<8x8xf32>
    %cst_112 = arith.constant dense<0.000000e+00> : vector<8x256xf32>
    %273 = tpu.matmul %213, %4, %cst_112 {dimension_numbers = #tpu.dot_dimension_numbers<[1], [0], [0], [1], [0, 0, 1, 1], [], []>} : vector<8x32xf32>, vector<32x256xf32>, vector<8x256xf32> -> vector<8x256xf32>
    %274 = vector.extract_strided_slice %273 {offsets = [0, 0], sizes = [8, 96], strides = [1, 1]} : vector<8x256xf32> to vector<8x96xf32>
    %275 = vector.extract_strided_slice %273 {offsets = [0, 96], sizes = [8, 96], strides = [1, 1]} : vector<8x256xf32> to vector<8x96xf32>
    %276 = vector.extract_strided_slice %273 {offsets = [0, 192], sizes = [8, 32], strides = [1, 1]} : vector<8x256xf32> to vector<8x32xf32>
    %277 = vector.extract_strided_slice %273 {offsets = [0, 224], sizes = [8, 32], strides = [1, 1]} : vector<8x256xf32> to vector<8x32xf32>
    %278 = tpu.concatenate %274, %275 in 0 : vector<8x96xf32>, vector<8x96xf32> -> vector<16x96xf32>
    %cst_113 = arith.constant dense<0.000000e+00> : vector<8x96xf32>
    %279 = tpu.matmul %266, %278, %cst_113 {dimension_numbers = #tpu.dot_dimension_numbers<[1], [0], [0], [1], [0, 0, 1, 1], [], []>} : vector<8x16xf32>, vector<16x96xf32>, vector<8x96xf32> -> vector<8x96xf32>
    %280 = arith.addf %1, %279 : vector<8x96xf32>
    %281 = vector.extract_strided_slice %280 {offsets = [0, 0], sizes = [8, 32], strides = [1, 1]} : vector<8x96xf32> to vector<8x32xf32>
    %282 = arith.negf %281 : vector<8x32xf32>
    %283 = math.exp %282 : vector<8x32xf32>
    %cst_114 = arith.constant 1.000000e+00 : f32
    %284 = vector.broadcast %cst_114 : f32 to vector<8x32xf32>
    %285 = arith.addf %284, %283 : vector<8x32xf32>
    %286 = arith.divf %284, %285 : vector<8x32xf32>
    %287 = vector.extract_strided_slice %280 {offsets = [0, 32], sizes = [8, 32], strides = [1, 1]} : vector<8x96xf32> to vector<8x32xf32>
    %288 = arith.negf %287 : vector<8x32xf32>
    %289 = math.exp %288 : vector<8x32xf32>
    %cst_115 = arith.constant 1.000000e+00 : f32
    %290 = vector.broadcast %cst_115 : f32 to vector<8x32xf32>
    %291 = arith.addf %290, %289 : vector<8x32xf32>
    %292 = arith.divf %290, %291 : vector<8x32xf32>
    %293 = vector.extract_strided_slice %280 {offsets = [0, 64], sizes = [8, 32], strides = [1, 1]} : vector<8x96xf32> to vector<8x32xf32>
    %294 = math.tanh %293 : vector<8x32xf32>
    %295 = tpu.concatenate %3, %276, %277 in 0 : vector<8x32xf32>, vector<8x32xf32>, vector<8x32xf32> -> vector<24x32xf32>
    %cst_116 = arith.constant dense<0.000000e+00> : vector<8x32xf32>
    %296 = tpu.matmul %260, %295, %cst_116 {dimension_numbers = #tpu.dot_dimension_numbers<[1], [0], [0], [1], [0, 0, 1, 1], [], []>} : vector<8x24xf32>, vector<24x32xf32>, vector<8x32xf32> -> vector<8x32xf32>
    %297 = arith.negf %296 : vector<8x32xf32>
    %298 = math.exp %297 : vector<8x32xf32>
    %cst_117 = arith.constant 1.000000e+00 : f32
    %299 = vector.broadcast %cst_117 : f32 to vector<8x32xf32>
    %300 = arith.addf %299, %298 : vector<8x32xf32>
    %301 = arith.divf %299, %300 : vector<8x32xf32>
    %302 = arith.mulf %301, %216 : vector<8x32xf32>
    %303 = arith.mulf %286, %294 : vector<8x32xf32>
    %cst_118 = arith.constant dense<0.000000e+00> : vector<8x32xf32>
    %304 = tpu.matmul %272, %302, %cst_118 {dimension_numbers = #tpu.dot_dimension_numbers<[1], [0], [0], [1], [0, 0, 1, 1], [], []>} : vector<8x8xf32>, vector<8x32xf32>, vector<8x32xf32> -> vector<8x32xf32>
    %305 = arith.addf %303, %304 : vector<8x32xf32>
    %306 = math.tanh %305 : vector<8x32xf32>
    %307 = arith.mulf %292, %306 : vector<8x32xf32>
    %cst_119 = arith.constant dense<0.000000e+00> : vector<8xf32>
    %308 = vector.multi_reduction <add>, %272, %cst_119 [1] : vector<8x8xf32> to vector<8xf32>
    %309 = vector.shape_cast %308 : vector<8xf32> to vector<8x1xf32>
    %cst_120 = arith.constant 0.000000e+00 : f32
    %310 = vector.broadcast %cst_120 : f32 to vector<8x1xf32>
    %311 = arith.cmpf ogt, %309, %310 : vector<8x1xf32>
    %312 = arith.andi %311, %10 : vector<8x1xi1>
    %313 = vector.shape_cast %312 : vector<8x1xi1> to vector<8x1xi1>
    %314 = vector.broadcast %313 : vector<8x1xi1> to vector<8x32xi1>
    %315 = arith.select %314, %307, %213 : vector<8x32xi1>, vector<8x32xf32>
    %316 = vector.shape_cast %312 : vector<8x1xi1> to vector<8x1xi1>
    %317 = vector.broadcast %316 : vector<8x1xi1> to vector<8x32xi1>
    %318 = arith.select %317, %305, %216 : vector<8x32xi1>, vector<8x32xf32>
    %c3 = arith.constant 3 : index
    %c0_121 = arith.constant 0 : index
    %c0_122 = arith.constant 0 : index
    %c0_123 = arith.constant 0 : index
    %319 = vector.load %arg3[%c3, %c0_121, %c0_122, %c0_123] : memref<4x1x1x8xi32, #tpu.memory_space<vmem>>, vector<1x1x1x8xi32>
    %320 = vector.shape_cast %319 : vector<1x1x1x8xi32> to vector<1x1x8xi32>
    %321 = vector.shape_cast %320 : vector<1x1x8xi32> to vector<1x8xi32>
    %c3_124 = arith.constant 3 : index
    %c0_125 = arith.constant 0 : index
    %c0_126 = arith.constant 0 : index
    %c0_127 = arith.constant 0 : index
    %322 = vector.load %arg4[%c3_124, %c0_125, %c0_126, %c0_127] : memref<4x1x1x8xi32, #tpu.memory_space<vmem>>, vector<1x1x1x8xi32>
    %323 = vector.shape_cast %322 : vector<1x1x1x8xi32> to vector<1x1x8xi32>
    %324 = vector.shape_cast %323 : vector<1x1x8xi32> to vector<1x8xi32>
    %c3_128 = arith.constant 3 : index
    %c0_129 = arith.constant 0 : index
    %c0_130 = arith.constant 0 : index
    %c0_131 = arith.constant 0 : index
    %325 = vector.load %arg5[%c3_128, %c0_129, %c0_130, %c0_131] : memref<4x1x1x8xi32, #tpu.memory_space<vmem>>, vector<1x1x1x8xi32>
    %326 = vector.shape_cast %325 : vector<1x1x1x8xi32> to vector<1x1x8xi32>
    %327 = vector.shape_cast %326 : vector<1x1x8xi32> to vector<1x8xi32>
    %c3_132 = arith.constant 3 : index
    %c0_133 = arith.constant 0 : index
    %c0_134 = arith.constant 0 : index
    %c0_135 = arith.constant 0 : index
    %328 = vector.load %arg6[%c3_132, %c0_133, %c0_134, %c0_135] : memref<4x1x1x16xi32, #tpu.memory_space<vmem>>, vector<1x1x1x16xi32>
    %329 = vector.shape_cast %328 : vector<1x1x1x16xi32> to vector<1x1x16xi32>
    %330 = vector.shape_cast %329 : vector<1x1x16xi32> to vector<1x16xi32>
    %c3_136 = arith.constant 3 : index
    %c0_137 = arith.constant 0 : index
    %c0_138 = arith.constant 0 : index
    %c0_139 = arith.constant 0 : index
    %331 = vector.load %arg7[%c3_136, %c0_137, %c0_138, %c0_139] : memref<4x1x1x8xi32, #tpu.memory_space<vmem>>, vector<1x1x1x8xi32>
    %332 = vector.shape_cast %331 : vector<1x1x1x8xi32> to vector<1x1x8xi32>
    %333 = vector.shape_cast %332 : vector<1x1x8xi32> to vector<1x8xi32>
    %c8_i32_140 = arith.constant 8 : i32
    %334 = vector.broadcast %c8_i32_140 : i32 to vector<1x1x24xi32>
    %335 = arith.cmpi slt, %5, %334 : vector<1x1x24xi32>
    %336 = vector.shape_cast %321 : vector<1x8xi32> to vector<1x8x1xi32>
    %c16_i32_141 = arith.constant 16 : i32
    %337 = vector.broadcast %c16_i32_141 : i32 to vector<1x1x24xi32>
    %338 = arith.cmpi slt, %5, %337 : vector<1x1x24xi32>
    %339 = vector.shape_cast %324 : vector<1x8xi32> to vector<1x8x1xi32>
    %c8_i32_142 = arith.constant 8 : i32
    %340 = vector.broadcast %c8_i32_142 : i32 to vector<1x8x1xi32>
    %341 = arith.addi %339, %340 : vector<1x8x1xi32>
    %342 = vector.shape_cast %327 : vector<1x8xi32> to vector<1x8x1xi32>
    %c16_i32_143 = arith.constant 16 : i32
    %343 = vector.broadcast %c16_i32_143 : i32 to vector<1x8x1xi32>
    %344 = arith.addi %342, %343 : vector<1x8x1xi32>
    %345 = vector.shape_cast %338 : vector<1x1x24xi1> to vector<1x1x24xi1>
    %346 = vector.broadcast %345 : vector<1x1x24xi1> to vector<1x8x24xi1>
    %347 = vector.shape_cast %341 : vector<1x8x1xi32> to vector<1x8x1xi32>
    %348 = vector.broadcast %347 : vector<1x8x1xi32> to vector<1x8x24xi32>
    %349 = vector.shape_cast %344 : vector<1x8x1xi32> to vector<1x8x1xi32>
    %350 = vector.broadcast %349 : vector<1x8x1xi32> to vector<1x8x24xi32>
    %351 = arith.select %346, %348, %350 : vector<1x8x24xi1>, vector<1x8x24xi32>
    %352 = vector.shape_cast %335 : vector<1x1x24xi1> to vector<1x1x24xi1>
    %353 = vector.broadcast %352 : vector<1x1x24xi1> to vector<1x8x24xi1>
    %354 = vector.shape_cast %336 : vector<1x8x1xi32> to vector<1x8x1xi32>
    %355 = vector.broadcast %354 : vector<1x8x1xi32> to vector<1x8x24xi32>
    %356 = arith.select %353, %355, %351 : vector<1x8x24xi1>, vector<1x8x24xi32>
    %357 = vector.broadcast %5 : vector<1x1x24xi32> to vector<1x8x24xi32>
    %358 = arith.cmpi eq, %356, %357 : vector<1x8x24xi32>
    %cst_144 = arith.constant 1.000000e+00 : f32
    %cst_145 = arith.constant 0.000000e+00 : f32
    %359 = vector.broadcast %cst_144 : f32 to vector<1x8x24xf32>
    %360 = vector.broadcast %cst_145 : f32 to vector<1x8x24xf32>
    %361 = arith.select %358, %359, %360 : vector<1x8x24xi1>, vector<1x8x24xf32>
    %362 = vector.shape_cast %361 : vector<1x8x24xf32> to vector<8x24xf32>
    %363 = vector.broadcast %6 : vector<8x1xi32> to vector<8x16xi32>
    %364 = vector.broadcast %330 : vector<1x16xi32> to vector<8x16xi32>
    %365 = arith.cmpi eq, %363, %364 : vector<8x16xi32>
    %cst_146 = arith.constant 1.000000e+00 : f32
    %cst_147 = arith.constant 0.000000e+00 : f32
    %366 = vector.broadcast %cst_146 : f32 to vector<8x16xf32>
    %367 = vector.broadcast %cst_147 : f32 to vector<8x16xf32>
    %368 = arith.select %365, %366, %367 : vector<8x16xi1>, vector<8x16xf32>
    %369 = vector.broadcast %6 : vector<8x1xi32> to vector<8x8xi32>
    %370 = vector.broadcast %333 : vector<1x8xi32> to vector<8x8xi32>
    %371 = arith.cmpi eq, %369, %370 : vector<8x8xi32>
    %cst_148 = arith.constant 1.000000e+00 : f32
    %cst_149 = arith.constant 0.000000e+00 : f32
    %372 = vector.broadcast %cst_148 : f32 to vector<8x8xf32>
    %373 = vector.broadcast %cst_149 : f32 to vector<8x8xf32>
    %374 = arith.select %371, %372, %373 : vector<8x8xi1>, vector<8x8xf32>
    %cst_150 = arith.constant dense<0.000000e+00> : vector<8x256xf32>
    %375 = tpu.matmul %315, %4, %cst_150 {dimension_numbers = #tpu.dot_dimension_numbers<[1], [0], [0], [1], [0, 0, 1, 1], [], []>} : vector<8x32xf32>, vector<32x256xf32>, vector<8x256xf32> -> vector<8x256xf32>
    %376 = vector.extract_strided_slice %375 {offsets = [0, 0], sizes = [8, 96], strides = [1, 1]} : vector<8x256xf32> to vector<8x96xf32>
    %377 = vector.extract_strided_slice %375 {offsets = [0, 96], sizes = [8, 96], strides = [1, 1]} : vector<8x256xf32> to vector<8x96xf32>
    %378 = vector.extract_strided_slice %375 {offsets = [0, 192], sizes = [8, 32], strides = [1, 1]} : vector<8x256xf32> to vector<8x32xf32>
    %379 = vector.extract_strided_slice %375 {offsets = [0, 224], sizes = [8, 32], strides = [1, 1]} : vector<8x256xf32> to vector<8x32xf32>
    %380 = tpu.concatenate %376, %377 in 0 : vector<8x96xf32>, vector<8x96xf32> -> vector<16x96xf32>
    %cst_151 = arith.constant dense<0.000000e+00> : vector<8x96xf32>
    %381 = tpu.matmul %368, %380, %cst_151 {dimension_numbers = #tpu.dot_dimension_numbers<[1], [0], [0], [1], [0, 0, 1, 1], [], []>} : vector<8x16xf32>, vector<16x96xf32>, vector<8x96xf32> -> vector<8x96xf32>
    %382 = arith.addf %1, %381 : vector<8x96xf32>
    %383 = vector.extract_strided_slice %382 {offsets = [0, 0], sizes = [8, 32], strides = [1, 1]} : vector<8x96xf32> to vector<8x32xf32>
    %384 = arith.negf %383 : vector<8x32xf32>
    %385 = math.exp %384 : vector<8x32xf32>
    %cst_152 = arith.constant 1.000000e+00 : f32
    %386 = vector.broadcast %cst_152 : f32 to vector<8x32xf32>
    %387 = arith.addf %386, %385 : vector<8x32xf32>
    %388 = arith.divf %386, %387 : vector<8x32xf32>
    %389 = vector.extract_strided_slice %382 {offsets = [0, 32], sizes = [8, 32], strides = [1, 1]} : vector<8x96xf32> to vector<8x32xf32>
    %390 = arith.negf %389 : vector<8x32xf32>
    %391 = math.exp %390 : vector<8x32xf32>
    %cst_153 = arith.constant 1.000000e+00 : f32
    %392 = vector.broadcast %cst_153 : f32 to vector<8x32xf32>
    %393 = arith.addf %392, %391 : vector<8x32xf32>
    %394 = arith.divf %392, %393 : vector<8x32xf32>
    %395 = vector.extract_strided_slice %382 {offsets = [0, 64], sizes = [8, 32], strides = [1, 1]} : vector<8x96xf32> to vector<8x32xf32>
    %396 = math.tanh %395 : vector<8x32xf32>
    %397 = tpu.concatenate %3, %378, %379 in 0 : vector<8x32xf32>, vector<8x32xf32>, vector<8x32xf32> -> vector<24x32xf32>
    %cst_154 = arith.constant dense<0.000000e+00> : vector<8x32xf32>
    %398 = tpu.matmul %362, %397, %cst_154 {dimension_numbers = #tpu.dot_dimension_numbers<[1], [0], [0], [1], [0, 0, 1, 1], [], []>} : vector<8x24xf32>, vector<24x32xf32>, vector<8x32xf32> -> vector<8x32xf32>
    %399 = arith.negf %398 : vector<8x32xf32>
    %400 = math.exp %399 : vector<8x32xf32>
    %cst_155 = arith.constant 1.000000e+00 : f32
    %401 = vector.broadcast %cst_155 : f32 to vector<8x32xf32>
    %402 = arith.addf %401, %400 : vector<8x32xf32>
    %403 = arith.divf %401, %402 : vector<8x32xf32>
    %404 = arith.mulf %403, %318 : vector<8x32xf32>
    %405 = arith.mulf %388, %396 : vector<8x32xf32>
    %cst_156 = arith.constant dense<0.000000e+00> : vector<8x32xf32>
    %406 = tpu.matmul %374, %404, %cst_156 {dimension_numbers = #tpu.dot_dimension_numbers<[1], [0], [0], [1], [0, 0, 1, 1], [], []>} : vector<8x8xf32>, vector<8x32xf32>, vector<8x32xf32> -> vector<8x32xf32>
    %407 = arith.addf %405, %406 : vector<8x32xf32>
    %408 = math.tanh %407 : vector<8x32xf32>
    %409 = arith.mulf %394, %408 : vector<8x32xf32>
    %cst_157 = arith.constant dense<0.000000e+00> : vector<8xf32>
    %410 = vector.multi_reduction <add>, %374, %cst_157 [1] : vector<8x8xf32> to vector<8xf32>
    %411 = vector.shape_cast %410 : vector<8xf32> to vector<8x1xf32>
    %cst_158 = arith.constant 0.000000e+00 : f32
    %412 = vector.broadcast %cst_158 : f32 to vector<8x1xf32>
    %413 = arith.cmpf ogt, %411, %412 : vector<8x1xf32>
    %414 = arith.andi %413, %10 : vector<8x1xi1>
    %415 = vector.shape_cast %414 : vector<8x1xi1> to vector<8x1xi1>
    %416 = vector.broadcast %415 : vector<8x1xi1> to vector<8x32xi1>
    %417 = arith.select %416, %409, %315 : vector<8x32xi1>, vector<8x32xf32>
    %418 = vector.shape_cast %414 : vector<8x1xi1> to vector<8x1xi1>
    %419 = vector.broadcast %418 : vector<8x1xi1> to vector<8x32xi1>
    %420 = arith.select %419, %407, %318 : vector<8x32xi1>, vector<8x32xf32>
    %421 = vector.shape_cast %417 : vector<8x32xf32> to vector<1x8x32xf32>
    %c0_159 = arith.constant 0 : index
    %c0_160 = arith.constant 0 : index
    %c0_161 = arith.constant 0 : index
    %422 = vector.load %arg9[%c0_159, %c0_160, %c0_161] : memref<1x8x32xf32, #tpu.memory_space<vmem>>, vector<1x8x32xf32>
    tpu.vector_store %arg9[%c0_159, %c0_160, %c0_161], %421 {strides = array<i32>} : memref<1x8x32xf32, #tpu.memory_space<vmem>>, vector<1x8x32xf32>,
    %423 = vector.shape_cast %420 : vector<8x32xf32> to vector<1x8x32xf32>
    %c0_162 = arith.constant 0 : index
    %c0_163 = arith.constant 0 : index
    %c0_164 = arith.constant 0 : index
    %424 = vector.load %arg10[%c0_162, %c0_163, %c0_164] : memref<1x8x32xf32, #tpu.memory_space<vmem>>, vector<1x8x32xf32>
    tpu.vector_store %arg10[%c0_162, %c0_163, %c0_164], %423 {strides = array<i32>} : memref<1x8x32xf32, #tpu.memory_space<vmem>>, vector<1x8x32xf32>,
    return
  }
  func.func @transform_0(%arg0: i32) -> (i32, i32, i32) {
    %c0_i32 = arith.constant 0 : i32
    %c0_i32_0 = arith.constant 0 : i32
    %c0_i32_1 = arith.constant 0 : i32
    return %arg0, %c0_i32, %c0_i32_0 : i32, i32, i32
  }
  func.func @transform_1(%arg0: i32) -> (i32, i32, i32) {
    %c0_i32 = arith.constant 0 : i32
    %c0_i32_0 = arith.constant 0 : i32
    %c0_i32_1 = arith.constant 0 : i32
    return %arg0, %c0_i32, %c0_i32_0 : i32, i32, i32
  }
  func.func @transform_2(%arg0: i32) -> (i32, i32, i32, i32) {
    %c0_i32 = arith.constant 0 : i32
    %c0_i32_0 = arith.constant 0 : i32
    %c0_i32_1 = arith.constant 0 : i32
    %c0_i32_2 = arith.constant 0 : i32
    return %c0_i32, %arg0, %c0_i32_0, %c0_i32_1 : i32, i32, i32, i32
  }
  func.func @transform_3(%arg0: i32) -> (i32, i32, i32, i32) {
    %c0_i32 = arith.constant 0 : i32
    %c0_i32_0 = arith.constant 0 : i32
    %c0_i32_1 = arith.constant 0 : i32
    %c0_i32_2 = arith.constant 0 : i32
    return %c0_i32, %arg0, %c0_i32_0, %c0_i32_1 : i32, i32, i32, i32
  }
  func.func @transform_4(%arg0: i32) -> (i32, i32, i32, i32) {
    %c0_i32 = arith.constant 0 : i32
    %c0_i32_0 = arith.constant 0 : i32
    %c0_i32_1 = arith.constant 0 : i32
    %c0_i32_2 = arith.constant 0 : i32
    return %c0_i32, %arg0, %c0_i32_0, %c0_i32_1 : i32, i32, i32, i32
  }
  func.func @transform_5(%arg0: i32) -> (i32, i32, i32, i32) {
    %c0_i32 = arith.constant 0 : i32
    %c0_i32_0 = arith.constant 0 : i32
    %c0_i32_1 = arith.constant 0 : i32
    %c0_i32_2 = arith.constant 0 : i32
    return %c0_i32, %arg0, %c0_i32_0, %c0_i32_1 : i32, i32, i32, i32
  }
  func.func @transform_6(%arg0: i32) -> (i32, i32, i32, i32) {
    %c0_i32 = arith.constant 0 : i32
    %c0_i32_0 = arith.constant 0 : i32
    %c0_i32_1 = arith.constant 0 : i32
    %c0_i32_2 = arith.constant 0 : i32
    return %c0_i32, %arg0, %c0_i32_0, %c0_i32_1 : i32, i32, i32, i32
  }
  func.func @transform_7(%arg0: i32) -> (i32, i32) {
    %c0_i32 = arith.constant 0 : i32
    %c0_i32_0 = arith.constant 0 : i32
    %c0_i32_1 = arith.constant 0 : i32
    return %c0_i32, %c0_i32_0 : i32, i32
  }
  func.func @transform_8(%arg0: i32) -> (i32, i32, i32) {
    %c0_i32 = arith.constant 0 : i32
    %c0_i32_0 = arith.constant 0 : i32
    %c0_i32_1 = arith.constant 0 : i32
    return %arg0, %c0_i32, %c0_i32_0 : i32, i32, i32
  }
  func.func @transform_9(%arg0: i32) -> (i32, i32, i32) {
    %c0_i32 = arith.constant 0 : i32
    %c0_i32_0 = arith.constant 0 : i32
    %c0_i32_1 = arith.constant 0 : i32
    return %arg0, %c0_i32, %c0_i32_0 : i32, i32, i32
  }
}

</mosaic_0001>

<bundles_post_ra>
// kernel: nary_tree_forward.1
= control target key start
LH: loop header
LB: loop body
LE: loop exit
PB: predicated region body
PF: predicated region fallthrough
CT: control target
= control target key end

     0   :  { %s3403_s0 = inlined_call_operand.vmem [shape: f32[2,8,96], index: 0, kind: input, shape index: {}]   ;;  %s3404_s1 = inlined_call_operand.vmem [shape: f32[2,8,32], index: 1, kind: input, shape index: {}]   ;;  %s3405_s2 = inlined_call_operand.vmem [shape: s32[4,2,1,8], index: 2, kind: input, shape index: {}, may-alias: {2,6}]   ;;  %s3406_s3 = inlined_call_operand.vmem [shape: s32[4,2,1,8], index: 3, kind: input, shape index: {}]   ;;  %s3407_s4 = inlined_call_operand.vmem [shape: s32[4,2,1,8], index: 4, kind: input, shape index: {}]   ;;  %s3408_s5 = inlined_call_operand.vmem [shape: s32[4,2,1,16], index: 5, kind: input, shape index: {}]   ;;  %s3409_s6 = inlined_call_operand.vmem [shape: s32[4,2,1,8], index: 6, kind: input, shape index: {}, may-alias: {2,6}]   ;;  %s3410_s7 = inlined_call_operand.vmem [shape: f32[32,256], index: 7, kind: input, shape index: {}]   ;;  %s3411_s8 = inlined_call_operand.vmem [shape: f32[2,8,32], index: 8, kind: output, shape index: {0}]   ;;  %s3412_s9 = inlined_call_operand.hbm [shape: f32[2,8,32], index: 9, kind: output, shape index: {1}]  }
   0x1   :  { %3416 = sst [smem:[#allocation10_spill]] %s3403_s0 }
   0x2   :  { %3417 = sst [smem:[#allocation11_spill]] %s3404_s1 }
   0x3   :  { %15 = vsyncpa [#allocation8], 0 }
   0x4   :  { %17 = vsyncpa [#allocation8 + $0x1], 0  ;;  %s2939_s30 = smov 0   ;;  %s2941_s10 = smov 0  }
   0x5   :  { %s2943_s11 = smov 0   ;;  %s2945_s12 = smov 0  }
   0x6 LB: > { %s2960_s13 = sadd.s32 4294967295, %s2880_s12   ;;  %s2469_s14 = sadd.s32 4294967294, %s2880_s12   ;;  %s2880_s12 = sphi %s2945_s12, %s3436_s12   ;;  %s2876_s11 = sphi %s2943_s11, %s3435_s11   ;;  %s2872_s10 = sphi %s2941_s10, %s3434_s10   ;;  %s2868_s30 = sphi %s2939_s30, %s3433_s30  }
   0x7   : > { %s2964_s15 = sadd.s32 1, %s2880_s12   ;;  %s82_s16 = sadd.s32 1, %s2876_s11 }
   0x8   : > { %s79_s17 = ssub.s32 %s2880_s12, %s2964_s15  ;;  %p89_p0 = scmp.ne.s32.totalorder %s2876_s11, %s2872_s10 }
   0x9   : > { %p80_p1 = scmp.eq.s32.totalorder %s79_s17, 0  ;;  %p90_p2 = scmp.eq.s32.totalorder %s2880_s12, 0 }
   0xa   : > { %p270_p3 = scmp.eq.s32.totalorder %s2960_s13, 1  ;;  %p275_p4 = scmp.ne.s32.totalorder %s2872_s10, %s2868_s30 }
   0xb   : > { %s2976_s18 = scalar_select %p80_p1, %s2876_s11, %s82_s16  }
   0xc   : > { %p2978_p5 = por %p90_p2, %p89_p0  ;;  %p2982_p6 = por %p270_p3, %p89_p0 }
   0xd   : > { %p276_p7 = scmp.eq.s32.totalorder %s2469_s14, 1  ;;  %p2471_p9 = scmp.ge.s32.totalorder %s2880_s12, 2 }
   0xf   : > { %p2986_p8 = por %p276_p7, %p275_p4  ;;  %295 = sbr.rel (%p2471_p9) target bundleno = 57 (0x39), region = 20 }
  0x16   : > { %312 = sbr.rel (!%p2978_p5) target bundleno = 29 (0x1d), region = 32  ;;  %s314_s22 = sand.u32 (%p2978_p5), 1, %s2876_s11  }
  0x17   : > { %s317_s25 = scalar_lea.vmem (%p2978_p5), %s3405_s2, %s2880_s12  ;;  %s2472_s26 = sshll.u32 (%p2978_p5), %s314_s22, 2 }
  0x18   : > { %v333_v0 = vld [vmem:[%s317_s25] sm:$0x1] (%p2978_p5)  ;;  %v335_v1 = vld [vmem:[%s317_s25 + $0x2] sm:$0x1] (%p2978_p5)  ;;  %v337_v2 = vld [vmem:[%s317_s25 + $0x4] sm:$0x1] (%p2978_p5) }
  0x19   : > { %v339_v3 = vld [vmem:[%s317_s25 + $0x6] sm:$0x1] (%p2978_p5)  ;;  %s316_s27 = scalar_lea.vmem (%p2978_p5), [#allocation2], %s2472_s26 }
  0x1a   : > { %334 = vst [vmem:[%s316_s27] sm:$0x1] (%p2978_p5), %v333_v0  ;;  %336 = vst [vmem:[%s316_s27 + $0x1] sm:$0x1] (%p2978_p5), %v335_v1 }
  0x1b   : > { %338 = vst [vmem:[%s316_s27 + $0x2] sm:$0x1] (%p2978_p5), %v337_v2  ;;  %340 = vst [vmem:[%s316_s27 + $0x3] sm:$0x1] (%p2978_p5), %v339_v3 }
  0x1d PF: > { %363 = sbr.rel (!%p2978_p5) target bundleno = 36 (0x24), region = 66  ;;  %s365_s28 = sand.u32 (%p2978_p5), 1, %s2876_s11  }
  0x1e   : > { %s368_s16 = scalar_lea.vmem (%p2978_p5), %s3406_s3, %s2880_s12  ;;  %s2473_s17 = sshll.u32 (%p2978_p5), %s365_s28, 2 }
  0x1f   : > { %v384_v4 = vld [vmem:[%s368_s16] sm:$0x1] (%p2978_p5)  ;;  %v386_v5 = vld [vmem:[%s368_s16 + $0x2] sm:$0x1] (%p2978_p5)  ;;  %v388_v6 = vld [vmem:[%s368_s16 + $0x4] sm:$0x1] (%p2978_p5) }
  0x20   : > { %v390_v7 = vld [vmem:[%s368_s16 + $0x6] sm:$0x1] (%p2978_p5)  ;;  %s367_s22 = scalar_lea.vmem (%p2978_p5), [#allocation3], %s2473_s17 }
  0x21   : > { %385 = vst [vmem:[%s367_s22] sm:$0x1] (%p2978_p5), %v384_v4  ;;  %387 = vst [vmem:[%s367_s22 + $0x1] sm:$0x1] (%p2978_p5), %v386_v5 }
  0x22   : > { %389 = vst [vmem:[%s367_s22 + $0x2] sm:$0x1] (%p2978_p5), %v388_v6  ;;  %391 = vst [vmem:[%s367_s22 + $0x3] sm:$0x1] (%p2978_p5), %v390_v7 }
  0x24 PF: > { %414 = sbr.rel (!%p2978_p5) target bundleno = 43 (0x2b), region = 100  ;;  %s416_s23 = sand.u32 (%p2978_p5), 1, %s2876_s11  }
  0x25   : > { %s419_s26 = scalar_lea.vmem (%p2978_p5), %s3407_s4, %s2880_s12  ;;  %s2474_s27 = sshll.u32 (%p2978_p5), %s416_s23, 2 }
  0x26   : > { %v435_v8 = vld [vmem:[%s419_s26] sm:$0x1] (%p2978_p5)  ;;  %v437_v9 = vld [vmem:[%s419_s26 + $0x2] sm:$0x1] (%p2978_p5)  ;;  %v439_v10 = vld [vmem:[%s419_s26 + $0x4] sm:$0x1] (%p2978_p5) }
  0x27   : > { %v441_v11 = vld [vmem:[%s419_s26 + $0x6] sm:$0x1] (%p2978_p5)  ;;  %s418_s28 = scalar_lea.vmem (%p2978_p5), [#allocation4], %s2474_s27 }
  0x28   : > { %436 = vst [vmem:[%s418_s28] sm:$0x1] (%p2978_p5), %v435_v8  ;;  %438 = vst [vmem:[%s418_s28 + $0x1] sm:$0x1] (%p2978_p5), %v437_v9 }
  0x29   : > { %440 = vst [vmem:[%s418_s28 + $0x2] sm:$0x1] (%p2978_p5), %v439_v10  ;;  %442 = vst [vmem:[%s418_s28 + $0x3] sm:$0x1] (%p2978_p5), %v441_v11 }
  0x2b PF: > { %465 = sbr.rel (!%p2978_p5) target bundleno = 50 (0x32), region = 134  ;;  %s467_s29 = sand.u32 (%p2978_p5), 1, %s2876_s11  }
  0x2c   : > { %s470_s17 = scalar_lea.vmem (%p2978_p5), %s3408_s5, %s2880_s12  ;;  %s2475_s22 = sshll.u32 (%p2978_p5), %s467_s29, 2 }
  0x2d   : > { %v486_v12 = vld [vmem:[%s470_s17] sm:$0x1] (%p2978_p5)  ;;  %v488_v13 = vld [vmem:[%s470_s17 + $0x2] sm:$0x1] (%p2978_p5)  ;;  %v490_v14 = vld [vmem:[%s470_s17 + $0x4] sm:$0x1] (%p2978_p5) }
  0x2e   : > { %v492_v15 = vld [vmem:[%s470_s17 + $0x6] sm:$0x1] (%p2978_p5)  ;;  %s469_s23 = scalar_lea.vmem (%p2978_p5), [#allocation5], %s2475_s22 }
  0x2f   : > { %487 = vst [vmem:[%s469_s23] sm:$0x1] (%p2978_p5), %v486_v12  ;;  %489 = vst [vmem:[%s469_s23 + $0x1] sm:$0x1] (%p2978_p5), %v488_v13 }
  0x30   : > { %491 = vst [vmem:[%s469_s23 + $0x2] sm:$0x1] (%p2978_p5), %v490_v14  ;;  %493 = vst [vmem:[%s469_s23 + $0x3] sm:$0x1] (%p2978_p5), %v492_v15 }
  0x32 PF: > { %516 = sbr.rel (!%p2978_p5) target bundleno = 57 (0x39), region = 168  ;;  %s518_s24 = sand.u32 (%p2978_p5), 1, %s2876_s11  }
  0x33   : > { %s521_s27 = scalar_lea.vmem (%p2978_p5), %s3409_s6, %s2880_s12  ;;  %s2476_s28 = sshll.u32 (%p2978_p5), %s518_s24, 2 }
  0x34   : > { %v537_v16 = vld [vmem:[%s521_s27] sm:$0x1] (%p2978_p5)  ;;  %v539_v17 = vld [vmem:[%s521_s27 + $0x2] sm:$0x1] (%p2978_p5)  ;;  %v541_v18 = vld [vmem:[%s521_s27 + $0x4] sm:$0x1] (%p2978_p5) }
  0x35   : > { %v543_v19 = vld [vmem:[%s521_s27 + $0x6] sm:$0x1] (%p2978_p5)  ;;  %s520_s29 = scalar_lea.vmem (%p2978_p5), [#allocation6], %s2476_s28 }
  0x36   : > { %538 = vst [vmem:[%s520_s29] sm:$0x1] (%p2978_p5), %v537_v16  ;;  %540 = vst [vmem:[%s520_s29 + $0x1] sm:$0x1] (%p2978_p5), %v539_v17 }
  0x37   : > { %542 = vst [vmem:[%s520_s29 + $0x2] sm:$0x1] (%p2978_p5), %v541_v18  ;;  %544 = vst [vmem:[%s520_s29 + $0x3] sm:$0x1] (%p2978_p5), %v543_v19 }
  0x39 PF: > { %p2477_p10 = scmp.ge.s32.totalorder %s2880_s12, 1  ;;  %p566_p11 = scmp.lt.s32.totalorder %s2880_s12, 3 }
  0x3b   : > { %p567_p12 = pnand %p2477_p10, %p566_p11 }
  0x3c   : > { %v679_v20 = vld [vmem:[%s3410_s7 + $0x8] sm:$0xff] (!%p567_p12)  ;;  %v681_v21 = vld [vmem:[%s3410_s7 + $0x18] sm:$0xff] (!%p567_p12)  ;;  %v678_v22 = vld [vmem:[%s3410_s7] sm:$0xff] (!%p567_p12)  ;;  %s3040_s24 = sand.u32 (!%p567_p12), 1, %s2872_s10   ;;  %v2882_v27 = vmov (!%p567_p12), 0.0   ;;  %v2883_v34 = vmov (!%p567_p12), 0.0|0.0   ;;  %v686_v39 = vlaneseq (!%p567_p12) }
  0x3d   : > { %570 = sbr.rel (%p567_p12) target bundleno = 4249 (0x1099), region = 202  ;;  %v3042_v23 = vpack.c.bf16 (!%p567_p12), %v681_v21, %v679_v20  ;;  %v680_v24 = vld [vmem:[%s3410_s7 + $0x10] sm:$0xff] (!%p567_p12)  ;;  %v683_v25 = vld [vmem:[%s3410_s7 + $0x28] sm:$0xff] (!%p567_p12)  ;;  %v685_v26 = vld [vmem:[%s3410_s7 + $0x38] sm:$0xff] (!%p567_p12)  ;;  %809 = vmatprep.mubr.f32.mxu0 (!%p567_p12), %v2882_v27  ;;  %s3055_s14 = sshll.u32 (!%p567_p12), %s3040_s24, 2  ;;  %2677 = vmatprep.subr.bf16.mxu1 (!%p567_p12), %v2883_v34  ;;  %vm2884_vm0 = vmmov (!%p567_p12), 0  }
  0x3e   : > { %v3057_v28 = vpack.c.bf16 (!%p567_p12), %v680_v24, %v678_v22  ;;  %v3059_v29 = vpack.c.bf16 (!%p567_p12), %v685_v26, %v683_v25  ;;  %v682_v30 = vld [vmem:[%s3410_s7 + $0x20] sm:$0xff] (!%p567_p12)  ;;  %v684_v31 = vld [vmem:[%s3410_s7 + $0x30] sm:$0xff] (!%p567_p12)  ;;  %s3069_s25 = scalar_lea.vmem (!%p567_p12), [#allocation3], %s3055_s14  ;;  %2589 = vmatprep.mubr.msk.f32.mxu1 (!%p567_p12), %vm2884_vm0, %v2882_v27  ;;  %s3413_s26 = smov (!%p567_p12), 32   ;;  %v3099_v42 = vshrl.u32 (!%p567_p12), %v686_v39, 7  ;;  %vm741_vm1 = vcmask (!%p567_p12), 261120  }
  0x3f   : > { %2670 = vmatprep.subr.bf16.mxu0 (!%p567_p12), %v3042_v23  ;;  %v2488_v32 = vld [vmem:[%s3069_s25] ss:$0 sm:$0xff] (!%p567_p12)  ;;  %v3073_v33 = vpack.c.bf16 (!%p567_p12), %v684_v31, %v682_v30  ;;  %s2886_s27 = smov (!%p567_p12), 64   ;;  %s3087_s28 = scalar_lea.vmem (!%p567_p12), [#allocation2], %s3055_s14  ;;  %v3109_v45 = vand.u32 (!%p567_p12), 127, %v686_v39  ;;  %vm824_vm3 = vcmask (!%p567_p12), 130048  }
  0x40   : > { %2672 = vmatpush1.bf16.msra.mxu0 (!%p567_p12), %v3057_v28  ;;  %710 = vbcast.lane.b32.xlu1 (!%p567_p12), %v2488_v32, 256  ;;  %v2487_v37 = vld [vmem:[%s3087_s28] ss:$0 sm:$0xff] (!%p567_p12)  ;;  %s3092_s29 = scalar_lea.vmem (!%p567_p12), [#allocation4], %s3055_s14  ;;  %p664_p13 = scmp.lt.s32.totalorder (!%p567_p12), %s2960_s13, 1  ;;  %vm910_vm7 = vcmask (!%p567_p12), 195584  }
  0x41   : > { %2674 = vmatprep.subr.bf16.mxu0 (!%p567_p12), %v3059_v29  ;;  %v2489_v38 = vld [vmem:[%s3092_s29] ss:$0 sm:$0xff] (!%p567_p12)  ;;  %s3102_s17 = scalar_lea.vmem (!%p567_p12), [#allocation5], %s3055_s14  ;;  %s3421_s1 = sld [smem:[#allocation11_spill]] (!%p567_p12)  ;;  %vm704_vm4 = vcmp.lt.s32.totalorder (!%p567_p12), %v3109_v45, 16  ;;  %vm696_vm5 = vcmp.lt.s32.totalorder (!%p567_p12), %v3109_v45, 8 }
  0x42   : > { %v2490_v43 = vld [vmem:[%s3102_s17] ss:$0 sm:$0xff] (!%p567_p12)  ;;  %vm996_vm9 = vcmask (!%p567_p12), 64512   ;;  %s3422_s0 = sld [smem:[#allocation10_spill]] (!%p567_p12)  ;;  %vm690_vm10 = vcmp.ne.s32.totalorder (!%p567_p12), %v3099_v42, 0 }
  0x43   : > { %vm733_vm2 = vcmp.eq.s32.totalorder (!%p567_p12), %v3099_v42, %v2490_v43  ;;  %v2503_v26 = vld [vmem:[%s3069_s25 + $0x1] ss:$0 sm:$0xff] (!%p567_p12)  ;;  %v2505_v39 = vld [vmem:[%s3102_s17 + $0x1] ss:$0 sm:$0xff] (!%p567_p12) }
  0x44   : > { %2676 = vmatpush1.bf16.msra.mxu0 %v3073_v33  ;;  %s665_s19 = scalar_select %p664_p13, %s2960_s13, 1  ;;  %v734_v51 = vsel %vm733_vm2, 1.0, %v2882_v27  ;;  %vm1127_vm13 = vcmp.eq.s32.totalorder %v3099_v42, %v2505_v39 }
  0x45   : > { %2601 = vmatprep.subr.mxu0 %v2882_v27 }
  0x46   : > { %s3097_s16 = sshll.u32 %s665_s19, 3  ;;  %s3415_s19 = smov 96  }
  0x47   : > { %810 = vmatmul.mubr.f32.vlgmr.msra.gmra.mrb[0].mxu0 %v2882_v27 }
  0x48   : > { %2603 = vmatprep.mubr.msk.f32.mxu0 %vm2884_vm0, %v2882_v27  ;;  %s667_s23 = scalar_lea.vmem %s3422_s0, %s3097_s16 }
  0x49   : > { %v3148_v62 = vld [vmem:[%s667_s23] sm:$0xff]  ;;  %s2273_s23 = scalar_lea.sflag [#allocation8], %s3040_s24 }
  0xb2   : > { %v711_v40 = vpop.permute.xlu1 %710 }
  0xb3   : > { %v712_v52 = vadd.s32 8, %v711_v40 }
 0x11a   : > { %v811_v35 = vpop.f32.mrb[0].mxu0 }
 0x11b   : > { %818 = vrot.lane.b32.xlu0 %v811_v35, %s3413_s26  ;;  %v813_v36 = vpop.f32.mrb[1].mxu0 }
 0x11c   : > { %906 = vrot.lane.b32.xlu1 %v813_v36, %s2886_s27 }
 0x11f   : > { %820 = vrot.lane.b32.xlu0 %v813_v36, %s3413_s26  ;;  %s671_s26 = scalar_lea.vmem %s3421_s1, %s3097_s16  ;;  %v2502_v36 = vld [vmem:[%s3087_s28 + $0x1] ss:$0 sm:$0xff] }
 0x120   : > { %702 = vbcast.lane.b32.xlu1 %v2487_v37, 256  ;;  %v3113_v49 = vld [vmem:[%s671_s26] sm:$0xff]  ;;  %s3138_s26 = scalar_lea.vmem [#allocation6], %s3055_s14  ;;  %s3423_s14 = smov 32  }
 0x121   : > { %v2491_v59 = vld [vmem:[%s3138_s26] ss:$0 sm:$0xff] }
 0x122   : > { %vm739_vm8 = vcmp.eq.s32.totalorder %v3099_v42, %v2491_v59 }
 0x123   : > { %718 = vbcast.lane.b32.xlu0 %v2489_v38, 256  ;;  %v740_v60 = vsel %vm739_vm8, 1.0, %v2882_v27 }
 0x124   : > { %v1077_v61 = vsel %vm996_vm9, %v740_v60, 0.0 }
 0x144   : > { %1078 = vadd.xlane.f32.xlu1 %v1077_v61 }
 0x18d   : > { %v819_v41 = vpop.permute.xlu0 %818 }
 0x18e   : > { %v907_v46 = vpop.permute.xlu1 %906 }
 0x18f   : > { %v2681_v55 = vpack.c.bf16 %v907_v46, %v3113_v49  ;;  %v1128_v46 = vsel %vm1127_vm13, 1.0, %v2882_v27 }
 0x191   : > { %v821_v44 = vpop.permute.xlu0 %820 }
 0x192   : > { %v822_v47 = vsel %vm741_vm1, %v819_v41, %v821_v44  ;;  %v703_v54 = vpop.permute.xlu1 %702 }
 0x193   : > { %v2678_v48 = vpack.c.bf16 %v822_v47, %v811_v35  ;;  %v2504_v35 = vld [vmem:[%s3092_s29 + $0x1] ss:$0 sm:$0xff] }
 0x195   : > { %2679 = vmatpush3.bf16.msra.mxu1 %v2678_v48  ;;  %v719_v50 = vpop.permute.xlu0 %718 }
 0x196   : > { %v720_v53 = vadd.s32 16, %v719_v50  ;;  %2680 = vmatprep.subr.bf16.mxu1 %v2883_v34 }
 0x198   : > { %2590 = vmatmul.mubr.msk.f32.vlgmr.msra.gmra.mrb[0].mxu1 %vm824_vm3, %v734_v51  ;;  %v723_v56 = vsel %vm704_vm4, %v712_v52, %v720_v53 }
 0x199   : > { %v726_v57 = vsel %vm696_vm5, %v703_v54, %v723_v56  ;;  %2682 = vmatpush3.bf16.msra.mxu1 %v2681_v55  ;;  %2598 = vmatprep.mubr.msk.f32.mxu1 %vm2884_vm0, %v2882_v27  ;;  %v2506_v56 = vld [vmem:[%s3138_s26 + $0x1] ss:$0 sm:$0xff] }
 0x19a   : > { %vm727_vm6 = vcmp.eq.s32.totalorder %v726_v57, %v3109_v45  ;;  %2596 = vmatprep.subr.mxu1 %v2882_v27  ;;  %vm1133_vm15 = vcmp.eq.s32.totalorder %v3099_v42, %v2506_v56 }
 0x19b   : > { %v728_v58 = vsel %vm727_vm6, 1.0, %v2882_v27  ;;  %v1134_v57 = vsel %vm1133_vm15, 1.0, %v2882_v27 }
 0x19d   : > { %2597 = vmatpush3.msra.mxu1 %v821_v44 }
 0x19e   : > { %2599 = vmatmul.mubr.msk.f32.vlgmr.msra.gmra.mrb[2].mxu1 %vm910_vm7, %v728_v58  ;;  %2684 = vmatprep.subr.bf16.mxu1 %v3042_v23  ;;  %v1469_v58 = vsel %vm996_vm9, %v1134_v57, 0.0 }
 0x19f   : > { %2686 = vmatpush1.bf16.msra.mxu1 %v3057_v28  ;;  %1204 = vmatprep.mubr.f32.mxu1 %v2882_v27 }
 0x1a0   : > { %2688 = vmatprep.subr.bf16.mxu1 %v3059_v29  ;;  %1470 = vadd.xlane.f32.xlu1 %v1469_v58 }
 0x1a3   : > { %2690 = vmatpush1.bf16.msra.mxu1 %v3073_v33 }
 0x1a4   : > { %2622 = vmatprep.subr.mxu1 %v2882_v27 }
 0x1d1   : > { %v1079_v20 = vpop.xlane.xlu1 %1078 }
 0x1d2   : > { %vm1080_vm11 = vcmp.gt.f32.partialorder %v1079_v20, 0.0 }
 0x1d3   : > { %vm3163_vm12 = vmand %vm1080_vm11, %vm690_vm10 }
 0x26b   : > { %v894_v63 = vpop.f32.mrb[0].mxu1 }
 0x26c   : > { %v898_v0 = vadd.f32 %v894_v63, %v3148_v62  ;;  %v2591_v1 = vpop.f32.mrb[1].mxu1 }
 0x26e   : > { %2770 = vtanh.f32 %v898_v0  ;;  %v2493_v10 = vmul.f32 -1.442695, %v898_v0 }
 0x271   : > { %v980_v2 = vpop.f32.mrb[2].mxu1 }
 0x272   : > { %v2495_v3 = vmul.f32 -1.442695, %v980_v2  ;;  %v2600_v4 = vpop.f32.mrb[3].mxu1 }
 0x274   : > { %2772 = vpow2.f32 %v2495_v3 }
 0x278   : > { %v2771_v5 = vpop.eup %2770 }
 0x279   : > { %992 = vrot.lane.b32.xlu0 %v2771_v5, %s2886_s27 }
 0x27e   : > { %v2773_v6 = vpop.eup %2772 }
 0x27f   : > { %v987_v7 = vadd.f32 1.0, %v2773_v6 }
 0x281   : > { %2774 = vrcp.f32 %v987_v7 }
 0x282   : > { %2776 = vpow2.f32 %v2493_v10 }
 0x28b   : > { %v2775_v8 = vpop.eup %2774 }
 0x28c   : > { %v990_v9 = vmul.f32 0.0, %v2775_v8  ;;  %v2777_v11 = vpop.eup %2776 }
 0x28d   : > { %v902_v12 = vadd.f32 1.0, %v2777_v11 }
 0x28e   : > { %2602 = vmatpush3.msra.mxu0 %v990_v9 }
 0x28f   : > { %2604 = vmatmul.mubr.msk.f32.vlgmr.msra.gmra.mrb[2].mxu0 %vm996_vm9, %v740_v60  ;;  %2691 = vmatprep.subr.bf16.mxu0 %v2883_v34  ;;  %2778 = vrcp.f32 %v902_v12 }
 0x290   : > { %2610 = vmatprep.mubr.msk.f32.mxu0 %vm2884_vm0, %v2882_v27 }
 0x299   : > { %v2779_v14 = vpop.eup %2778 }
 0x2eb   : > { %v993_v13 = vpop.permute.xlu0 %992 }
 0x2ec   : > { %v995_v15 = vmul.f32 %v2779_v14, %v993_v13 }
 0x362   : > { %v1066_v16 = vpop.f32.mrb[2].mxu0 }
 0x363   : > { %v3156_v17 = vadd.f32 %v1066_v16, %v995_v15  ;;  %v2605_v18 = vpop.f32.mrb[3].mxu0 }
 0x364   : > { %v1471_v18 = vpop.xlane.xlu1 %1470 }
 0x365   : > { %2780 = vtanh.f32 %v3156_v17  ;;  %v3214_v6 = vsel %vm3163_vm12, %v3156_v17, 0.0  ;;  %vm1472_vm2 = vcmp.gt.f32.partialorder %v1471_v18, 0.0 }
 0x366   : > { %vm3227_vm6 = vmand %vm1472_vm2, %vm690_vm10 }
 0x36f   : > { %v2781_v19 = vpop.eup %2780 }
 0x370   : > { %1073 = vrot.lane.b32.xlu0 %v2781_v19, %s3423_s14 }
 0x3e2   : > { %v1074_v21 = vpop.permute.xlu0 %1073 }
 0x3e3   : > { %v1076_v22 = vmul.f32 %v2779_v14, %v1074_v21  ;;  %v2536_v21 = vld [vmem:[%s3092_s29 + $0x3] ss:$0 sm:$0xff] }
 0x3e5   : > { %v3169_v25 = vsel %vm3163_vm12, %v1076_v22, 0.0 }
 0x3e6   : > { %1136 = vrot.lane.b32.xlu0 %v3169_v25, %s3415_s19 }
 0x3ea   : > { %1108 = vbcast.lane.b32.xlu0 %v2503_v26, 256  ;;  %v2520_v26 = vld [vmem:[%s3092_s29 + $0x2] ss:$0 sm:$0xff] }
 0x458   : > { %v1137_v30 = vpop.permute.xlu0 %1136 }
 0x459   : > { %2507 = vmatmul.mubr.msk.f32.vlgmr.msra.gmra.mrb[4].mxu1 %vm741_vm1, %v1137_v30 }
 0x45a   : > { %2624 = vmatprep.mubr.msk.f32.mxu1 %vm2884_vm0, %v2882_v27 }
 0x45c   : > { %v1109_v37 = vpop.permute.xlu0 %1108 }
 0x45d   : > { %v1110_v51 = vadd.s32 8, %v1109_v37 }
 0x52c   : > { %v1206_v31 = vpop.f32.mrb[4].mxu1 }
 0x52d   : > { %1213 = vrot.lane.b32.xlu0 %v1206_v31, %s3423_s14  ;;  %v1208_v32 = vpop.f32.mrb[5].mxu1 }
 0x531   : > { %1215 = vrot.lane.b32.xlu0 %v1208_v32, %s3423_s14 }
 0x535   : > { %1116 = vbcast.lane.b32.xlu0 %v2504_v35, 256 }
 0x539   : > { %1300 = vrot.lane.b32.xlu0 %v1208_v32, %s2886_s27  ;;  %v2518_v32 = vld [vmem:[%s3087_s28 + $0x2] ss:$0 sm:$0xff] }
 0x53d   : > { %1101 = vbcast.lane.b32.xlu0 %v2502_v36, 256  ;;  %v2521_v36 = vld [vmem:[%s3102_s17 + $0x2] ss:$0 sm:$0xff] }
 0x53e   : > { %vm1519_vm8 = vcmp.eq.s32.totalorder %v3099_v42, %v2521_v36 }
 0x59f   : > { %v1214_v38 = vpop.permute.xlu0 %1213 }
 0x5a3   : > { %v1216_v40 = vpop.permute.xlu0 %1215 }
 0x5a4   : > { %v1217_v41 = vsel %vm741_vm1, %v1214_v38, %v1216_v40 }
 0x5a5   : > { %v2692_v43 = vpack.c.bf16 %v1217_v41, %v1206_v31  ;;  %v1520_v41 = vsel %vm1519_vm8, 1.0, %v2882_v27 }
 0x5a7   : > { %2693 = vmatpush3.bf16.msra.mxu0 %v2692_v43  ;;  %v1117_v44 = vpop.permute.xlu0 %1116 }
 0x5a8   : > { %2694 = vmatprep.subr.bf16.mxu0 %v2883_v34  ;;  %v1118_v47 = vadd.s32 16, %v1117_v44 }
 0x5aa   : > { %2611 = vmatmul.mubr.msk.f32.vlgmr.msra.gmra.mrb[4].mxu0 %vm824_vm3, %v1128_v46  ;;  %v1119_v52 = vsel %vm704_vm4, %v1110_v51, %v1118_v47 }
 0x5ab   : > { %v1301_v48 = vpop.permute.xlu0 %1300  ;;  %2619 = vmatprep.mubr.msk.f32.mxu0 %vm2884_vm0, %v2882_v27 }
 0x5ac   : > { %v2695_v50 = vpack.c.bf16 %v1301_v48, %v3113_v49 }
 0x5ae   : > { %2696 = vmatpush3.bf16.msra.mxu0 %v2695_v50 }
 0x5af   : > { %v1102_v53 = vpop.permute.xlu0 %1101  ;;  %2617 = vmatprep.subr.mxu0 %v2882_v27 }
 0x5b0   : > { %v1120_v54 = vsel %vm696_vm5, %v1102_v53, %v1119_v52 }
 0x5b1   : > { %vm1121_vm14 = vcmp.eq.s32.totalorder %v1120_v54, %v3109_v45  ;;  %v2522_v54 = vld [vmem:[%s3138_s26 + $0x2] ss:$0 sm:$0xff] }
 0x5b2   : > { %v1122_v55 = vsel %vm1121_vm14, 1.0, %v2882_v27  ;;  %2618 = vmatpush3.msra.mxu0 %v1216_v40  ;;  %vm1525_vm12 = vcmp.eq.s32.totalorder %v3099_v42, %v2522_v54 }
 0x5b3   : > { %2620 = vmatmul.mubr.msk.f32.vlgmr.msra.gmra.mrb[6].mxu0 %vm910_vm7, %v1122_v55  ;;  %2698 = vmatprep.subr.bf16.mxu0 %v3042_v23  ;;  %v1526_v55 = vsel %vm1525_vm12, 1.0, %v2882_v27 }
 0x5b4   : > { %2700 = vmatpush1.bf16.msra.mxu0 %v3057_v28  ;;  %1596 = vmatprep.mubr.f32.mxu0 %v2882_v27  ;;  %v1861_v56 = vsel %vm996_vm9, %v1526_v55, 0.0 }
 0x5b5   : > { %2702 = vmatprep.subr.bf16.mxu0 %v3059_v29 }
 0x5b8   : > { %2704 = vmatpush1.bf16.msra.mxu0 %v3073_v33 }
 0x5b9   : > { %2643 = vmatprep.subr.mxu0 %v2882_v27 }
 0x67d   : > { %v1288_v59 = vpop.f32.mrb[4].mxu0 }
 0x67e   : > { %v1292_v60 = vadd.f32 %v1288_v59, %v3148_v62  ;;  %v2612_v61 = vpop.f32.mrb[5].mxu0 }
 0x680   : > { %2782 = vtanh.f32 %v1292_v60  ;;  %v2509_v8 = vmul.f32 -1.442695, %v1292_v60 }
 0x686   : > { %v1373_v63 = vpop.f32.mrb[6].mxu0 }
 0x687   : > { %v2511_v0 = vmul.f32 -1.442695, %v1373_v63  ;;  %v2621_v1 = vpop.f32.mrb[7].mxu0 }
 0x689   : > { %2784 = vpow2.f32 %v2511_v0 }
 0x68a   : > { %v2783_v2 = vpop.eup %2782 }
 0x68b   : > { %1385 = vrot.lane.b32.xlu0 %v2783_v2, %s2886_s27 }
 0x693   : > { %v2785_v3 = vpop.eup %2784 }
 0x694   : > { %v1380_v4 = vadd.f32 1.0, %v2785_v3 }
 0x696   : > { %2786 = vrcp.f32 %v1380_v4 }
 0x697   : > { %2788 = vpow2.f32 %v2509_v8 }
 0x6a0   : > { %v2787_v5 = vpop.eup %2786 }
 0x6a1   : > { %v1383_v7 = vmul.f32 %v2787_v5, %v3214_v6  ;;  %v2789_v9 = vpop.eup %2788 }
 0x6a2   : > { %v1296_v10 = vadd.f32 1.0, %v2789_v9 }
 0x6a3   : > { %2623 = vmatpush3.msra.mxu1 %v1383_v7 }
 0x6a4   : > { %2625 = vmatmul.mubr.msk.f32.vlgmr.msra.gmra.mrb[6].mxu1 %vm996_vm9, %v1134_v57  ;;  %2705 = vmatprep.subr.bf16.mxu1 %v2883_v34  ;;  %2790 = vrcp.f32 %v1296_v10 }
 0x6a5   : > { %2631 = vmatprep.mubr.msk.f32.mxu1 %vm2884_vm0, %v2882_v27 }
 0x6ae   : > { %v2791_v12 = vpop.eup %2790 }
 0x6fd   : > { %v1386_v11 = vpop.permute.xlu0 %1385 }
 0x6fe   : > { %v1388_v13 = vmul.f32 %v2791_v12, %v1386_v11 }
 0x777   : > { %v1458_v14 = vpop.f32.mrb[6].mxu1 }
 0x778   : > { %v3221_v15 = vadd.f32 %v1458_v14, %v1388_v13  ;;  %v2626_v16 = vpop.f32.mrb[7].mxu1 }
 0x77a   : > { %2792 = vtanh.f32 %v3221_v15  ;;  %v3280_v0 = vsel %vm3227_vm6, %v3221_v15, %v3214_v6 }
 0x784   : > { %v2793_v17 = vpop.eup %2792 }
 0x785   : > { %1465 = vrot.lane.b32.xlu0 %v2793_v17, %s3423_s14  ;;  %v2535_v17 = vld [vmem:[%s3069_s25 + $0x3] ss:$0 sm:$0xff] }
 0x7f7   : > { %v1466_v19 = vpop.permute.xlu0 %1465 }
 0x7f8   : > { %v1468_v20 = vmul.f32 %v2791_v12, %v1466_v19 }
 0x7fa   : > { %v3234_v22 = vsel %vm3227_vm6, %v1468_v20, %v3169_v25  ;;  %v2519_v25 = vld [vmem:[%s3069_s25 + $0x2] ss:$0 sm:$0xff]  ;;  %s2483_s25 = sshll.u32 %s3040_s24, 3 }
 0x7fb   : > { %1528 = vrot.lane.b32.xlu1 %v3234_v22, %s3415_s19 }
 0x7ff   : > { %1508 = vbcast.lane.b32.xlu1 %v2520_v26, 256 }
 0x86d   : > { %v1529_v24 = vpop.permute.xlu1 %1528 }
 0x86e   : > { %2523 = vmatmul.mubr.msk.f32.vlgmr.msra.gmra.mrb[8].mxu0 %vm741_vm1, %v1529_v24 }
 0x86f   : > { %2645 = vmatprep.mubr.msk.f32.mxu0 %vm2884_vm0, %v2882_v27 }
 0x871   : > { %v1509_v43 = vpop.permute.xlu1 %1508 }
 0x872   : > { %v1510_v46 = vadd.s32 16, %v1509_v43 }
 0x941   : > { %v1598_v30 = vpop.f32.mrb[8].mxu0 }
 0x942   : > { %1605 = vrot.lane.b32.xlu0 %v1598_v30, %s3423_s14  ;;  %v1600_v31 = vpop.f32.mrb[9].mxu0 }
 0x946   : > { %1607 = vrot.lane.b32.xlu0 %v1600_v31, %s3423_s14 }
 0x94a   : > { %1500 = vbcast.lane.b32.xlu0 %v2519_v25, 256 }
 0x94e   : > { %1692 = vrot.lane.b32.xlu0 %v1600_v31, %s2886_s27 }
 0x952   : > { %1493 = vbcast.lane.b32.xlu0 %v2518_v32, 256 }
 0x971   : > { %1862 = vadd.xlane.f32.xlu0 %v1861_v56 }
 0x9b4   : > { %v1606_v35 = vpop.permute.xlu0 %1605 }
 0x9b8   : > { %v1608_v37 = vpop.permute.xlu0 %1607 }
 0x9b9   : > { %v1609_v38 = vsel %vm741_vm1, %v1606_v35, %v1608_v37 }
 0x9ba   : > { %v2706_v39 = vpack.c.bf16 %v1609_v38, %v1598_v30  ;;  %v2537_v30 = vld [vmem:[%s3102_s17 + $0x3] ss:$0 sm:$0xff] }
 0x9bb   : > { %vm1911_vm15 = vcmp.eq.s32.totalorder %v3099_v42, %v2537_v30 }
 0x9bc   : > { %2707 = vmatpush3.bf16.msra.mxu1 %v2706_v39  ;;  %v1501_v40 = vpop.permute.xlu0 %1500  ;;  %v1912_v36 = vsel %vm1911_vm15, 1.0, %v2882_v27 }
 0x9bd   : > { %2708 = vmatprep.subr.bf16.mxu1 %v2883_v34  ;;  %v1502_v44 = vadd.s32 8, %v1501_v40 }
 0x9bf   : > { %2632 = vmatmul.mubr.msk.f32.vlgmr.msra.gmra.mrb[8].mxu1 %vm824_vm3, %v1520_v41  ;;  %v1511_v51 = vsel %vm704_vm4, %v1502_v44, %v1510_v46  ;;  %v2538_v46 = vld [vmem:[%s3138_s26 + $0x3] ss:$0 sm:$0xff] }
 0x9c0   : > { %v1693_v47 = vpop.permute.xlu0 %1692  ;;  %2640 = vmatprep.mubr.msk.f32.mxu1 %vm2884_vm0, %v2882_v27 }
 0x9c1   : > { %v2709_v48 = vpack.c.bf16 %v1693_v47, %v3113_v49 }
 0x9c3   : > { %2710 = vmatpush3.bf16.msra.mxu1 %v2709_v48 }
 0x9c4   : > { %v1494_v50 = vpop.permute.xlu0 %1493  ;;  %2638 = vmatprep.subr.mxu1 %v2882_v27 }
 0x9c5   : > { %v1512_v52 = vsel %vm696_vm5, %v1494_v50, %v1511_v51 }
 0x9c6   : > { %vm1513_vm11 = vcmp.eq.s32.totalorder %v1512_v52, %v3109_v45 }
 0x9c7   : > { %v1514_v53 = vsel %vm1513_vm11, 1.0, %v2882_v27  ;;  %2639 = vmatpush3.msra.mxu1 %v1608_v37 }
 0x9c8   : > { %2641 = vmatmul.mubr.msk.f32.vlgmr.msra.gmra.mrb[10].mxu1 %vm910_vm7, %v1514_v53  ;;  %2712 = vmatprep.subr.bf16.mxu1 %v3042_v23 }
 0x9c9   : > { %2714 = vmatpush1.bf16.msra.mxu1 %v3057_v28  ;;  %1988 = vmatprep.mubr.f32.mxu1 %v2882_v27 }
 0x9ca   : > { %2716 = vmatprep.subr.bf16.mxu1 %v3059_v29 }
 0x9cd   : > { %2718 = vmatpush1.bf16.msra.mxu1 %v3073_v33 }
 0x9ce   : > { %2664 = vmatprep.subr.mxu1 %v2882_v27 }
 0x9fe   : > { %v1863_v12 = vpop.xlane.xlu0 %1862 }
 0x9ff   : > { %vm1864_vm13 = vcmp.gt.f32.partialorder %v1863_v12, 0.0 }
 0xa00   : > { %vm3293_vm14 = vmand %vm1864_vm13, %vm690_vm10 }
 0xa92   : > { %v1680_v57 = vpop.f32.mrb[8].mxu1 }
 0xa93   : > { %v1684_v23 = vadd.f32 %v1680_v57, %v3148_v62  ;;  %v2633_v28 = vpop.f32.mrb[9].mxu1 }
 0xa95   : > { %2794 = vtanh.f32 %v1684_v23  ;;  %v2525_v2 = vmul.f32 -1.442695, %v1684_v23 }
 0xa9b   : > { %v1765_v58 = vpop.f32.mrb[10].mxu1 }
 0xa9c   : > { %v2527_v59 = vmul.f32 -1.442695, %v1765_v58  ;;  %v2642_v29 = vpop.f32.mrb[11].mxu1 }
 0xa9e   : > { %2796 = vpow2.f32 %v2527_v59 }
 0xa9f   : > { %v2795_v33 = vpop.eup %2794 }
 0xaa0   : > { %1777 = vrot.lane.b32.xlu1 %v2795_v33, %s2886_s27 }
 0xaa8   : > { %v2797_v60 = vpop.eup %2796 }
 0xaa9   : > { %v1772_v61 = vadd.f32 1.0, %v2797_v60 }
 0xaab   : > { %2798 = vrcp.f32 %v1772_v61 }
 0xaac   : > { %2800 = vpow2.f32 %v2525_v2 }
 0xab5   : > { %v2799_v63 = vpop.eup %2798 }
 0xab6   : > { %v1775_v1 = vmul.f32 %v2799_v63, %v3280_v0  ;;  %v2801_v3 = vpop.eup %2800 }
 0xab7   : > { %v1688_v4 = vadd.f32 1.0, %v2801_v3 }
 0xab8   : > { %2644 = vmatpush3.msra.mxu0 %v1775_v1 }
 0xab9   : > { %2646 = vmatmul.mubr.msk.f32.vlgmr.msra.gmra.mrb[10].mxu0 %vm996_vm9, %v1526_v55  ;;  %2719 = vmatprep.subr.bf16.mxu0 %v2883_v34  ;;  %2802 = vrcp.f32 %v1688_v4 }
 0xaba   : > { %2652 = vmatprep.mubr.msk.f32.mxu0 %vm2884_vm0, %v2882_v27 }
 0xac3   : > { %v2803_v7 = vpop.eup %2802 }
 0xb12   : > { %v1778_v5 = vpop.permute.xlu1 %1777 }
 0xb13   : > { %v1780_v6 = vmul.f32 %v2803_v7, %v1778_v5 }
 0xb8c   : > { %v1850_v8 = vpop.f32.mrb[10].mxu0 }
 0xb8d   : > { %v3287_v9 = vadd.f32 %v1850_v8, %v1780_v6  ;;  %v2647_v10 = vpop.f32.mrb[11].mxu0 }
 0xb8f   : > { %2804 = vtanh.f32 %v3287_v9  ;;  %v1869_v57 = vsel %vm3293_vm14, %v3287_v9, %v3280_v0 }
 0xb99   : > { %v2805_v11 = vpop.eup %2804 }
 0xb9a   : > { %1857 = vrot.lane.b32.xlu1 %v2805_v11, %s3423_s14 }
 0xc0c   : > { %v1858_v13 = vpop.permute.xlu1 %1857 }
 0xc0d   : > { %v1860_v14 = vmul.f32 %v2803_v7, %v1858_v13 }
 0xc0f   : > { %v3300_v16 = vsel %vm3293_vm14, %v1860_v14, %v3234_v22  ;;  %v2534_v22 = vld [vmem:[%s3087_s28 + $0x3] ss:$0 sm:$0xff]  ;;  %s2546_s28 = sshll.u32 %s2960_s13, 7 }
 0xc10   : > { %1920 = vrot.lane.b32.xlu1 %v3300_v16, %s3415_s19  ;;  %s3356_s22 = scalar_lea.hbm %s3412_s9, %s2546_s28 }
 0xc14   : > { %1892 = vbcast.lane.b32.xlu1 %v2535_v17, 256 }
 0xc82   : > { %v1921_v18 = vpop.permute.xlu1 %1920 }
 0xc83   : > { %2539 = vmatmul.mubr.msk.f32.vlgmr.msra.gmra.mrb[12].mxu1 %vm741_vm1, %v1921_v18 }
 0xc84   : > { %2666 = vmatprep.mubr.msk.f32.mxu1 %vm2884_vm0, %v2882_v27 }
 0xc86   : > { %v1893_v24 = vpop.permute.xlu1 %1892 }
 0xc87   : > { %v1894_v40 = vadd.s32 8, %v1893_v24 }
 0xd56   : > { %v1990_v19 = vpop.f32.mrb[12].mxu1 }
 0xd57   : > { %1997 = vrot.lane.b32.xlu1 %v1990_v19, %s3423_s14  ;;  %v1992_v20 = vpop.f32.mrb[13].mxu1 }
 0xd5b   : > { %1999 = vrot.lane.b32.xlu1 %v1992_v20, %s3423_s14 }
 0xd5f   : > { %1900 = vbcast.lane.b32.xlu1 %v2536_v21, 256 }
 0xd63   : > { %2084 = vrot.lane.b32.xlu1 %v1992_v20, %s2886_s27 }
 0xd67   : > { %1885 = vbcast.lane.b32.xlu1 %v2534_v22, 256 }
 0xdc9   : > { %v1998_v26 = vpop.permute.xlu1 %1997 }
 0xdcd   : > { %v2000_v31 = vpop.permute.xlu1 %1999 }
 0xdce   : > { %v2001_v25 = vsel %vm741_vm1, %v1998_v26, %v2000_v31 }
 0xdcf   : > { %v2720_v32 = vpack.c.bf16 %v2001_v25, %v1990_v19 }
 0xdd1   : > { %2721 = vmatpush3.bf16.msra.mxu0 %v2720_v32  ;;  %v1901_v35 = vpop.permute.xlu1 %1900 }
 0xdd2   : > { %2722 = vmatprep.subr.bf16.mxu0 %v2883_v34  ;;  %v1902_v37 = vadd.s32 16, %v1901_v35 }
 0xdd4   : > { %2653 = vmatmul.mubr.msk.f32.vlgmr.msra.gmra.mrb[12].mxu0 %vm824_vm3, %v1912_v36  ;;  %v1903_v41 = vsel %vm704_vm4, %v1894_v40, %v1902_v37 }
 0xdd5   : > { %v2085_v38 = vpop.permute.xlu1 %2084  ;;  %2661 = vmatprep.mubr.msk.f32.mxu0 %vm2884_vm0, %v2882_v27  ;;  %vm1917_vm0 = vcmp.eq.s32.totalorder %v3099_v42, %v2538_v46 }
 0xdd6   : > { %v2723_v39 = vpack.c.bf16 %v2085_v38, %v3113_v49  ;;  %v1918_v49 = vsel %vm1917_vm0, 1.0, %v2882_v27 }
 0xdd7   : > { %v2253_v47 = vsel %vm996_vm9, %v1918_v49, 0.0 }
 0xdd8   : > { %2724 = vmatpush3.bf16.msra.mxu0 %v2723_v39  ;;  %2254 = vadd.xlane.f32.xlu1 %v2253_v47 }
 0xdd9   : > { %v1886_v43 = vpop.permute.xlu1 %1885  ;;  %2659 = vmatprep.subr.mxu0 %v2882_v27 }
 0xdda   : > { %v1904_v34 = vsel %vm696_vm5, %v1886_v43, %v1903_v41 }
 0xddb   : > { %vm1905_vm3 = vcmp.eq.s32.totalorder %v1904_v34, %v3109_v45 }
 0xddc   : > { %v1906_v44 = vsel %vm1905_vm3, 1.0, %v2882_v27  ;;  %2660 = vmatpush3.msra.mxu0 %v2000_v31 }
 0xddd   : > { %2662 = vmatmul.mubr.msk.f32.vlgmr.msra.gmra.mrb[14].mxu0 %vm910_vm7, %v1906_v44 }
 0xe65   : > { %v2255_v59 = vpop.xlane.xlu1 %2254 }
 0xe66   : > { %vm2256_vm4 = vcmp.gt.f32.partialorder %v2255_v59, 0.0 }
 0xe67   : > { %vm3344_vm5 = vmand %vm2256_vm4, %vm690_vm10 }
 0xea7   : > { %v2072_v48 = vpop.f32.mrb[12].mxu0 }
 0xea8   : > { %v2076_v50 = vadd.f32 %v2072_v48, %v3148_v62  ;;  %v2654_v51 = vpop.f32.mrb[13].mxu0 }
 0xeaa   : > { %2806 = vtanh.f32 %v2076_v50  ;;  %v2541_v23 = vmul.f32 -1.442695, %v2076_v50 }
 0xeb0   : > { %v2157_v52 = vpop.f32.mrb[14].mxu0 }
 0xeb1   : > { %v2543_v45 = vmul.f32 -1.442695, %v2157_v52  ;;  %v2663_v53 = vpop.f32.mrb[15].mxu0 }
 0xeb3   : > { %2808 = vpow2.f32 %v2543_v45 }
 0xeb4   : > { %v2807_v54 = vpop.eup %2806 }
 0xeb5   : > { %2169 = vrot.lane.b32.xlu0 %v2807_v54, %s2886_s27  ;;  %s663_s27 = scalar_lea.vmem [#allocation7], %s2483_s25  ;;  %s2888_s25 = smov [#allocation7]  }
 0xeb6   : > { %s2289_s29 = sshll.u32 %s663_s27, 4  ;;  %s2822_s0 = sshll.u32 %s2888_s25, 4  ;;  %s2290_s29 = int_to_ptr.vmem [resolvable:$true] %s2289_s29  ;;  %s2823_s0 = int_to_ptr.vmem [resolvable:$false] %s2822_s0 }
 0xeb7   : > { %s2818_s19 = scalar_lea.vmem %s2290_s29, 128  ;;  %s2824_s1 = scalar_lea.vmem %s2823_s0, 256 }
 0xeb8   : > { %p2819_p0 = scmp.ne.s32.totalorder %s2290_s29, %s2818_s19  ;;  %p2825_p3 = scmp.lt.s32.totalorder %s2290_s29, %s2823_s0 }
 0xeb9   : > { %p2826_p4 = scmp.lt.s32.totalorder %s2824_s1, %s2818_s19 }
 0xeba   : > { %p2820_p1 = pnand %p2819_p0, %p2982_p6 }
 0xebb   : > { %p2827_p5 = por %p2826_p4, %p2825_p3 }
 0xebc   : > { %p2821_p2 = pneg %p2820_p1 }
 0xebd   : > { %v2809_v55 = vpop.eup %2808 }
 0xebe   : > { %v2164_v56 = vadd.f32 1.0, %v2809_v55  ;;  %p2828_p7 = pnand %p2827_p5, %p2821_p2 }
 0xec0   : > { %2810 = vrcp.f32 %v2164_v56 }
 0xec1   : > { %2812 = vpow2.f32 %v2541_v23 }
 0xeca   : > { %v2811_v27 = vpop.eup %2810 }
 0xecb   : > { %v2167_v62 = vmul.f32 %v2811_v27, %v1869_v57  ;;  %v2813_v28 = vpop.eup %2812 }
 0xecc   : > { %v2080_v58 = vadd.f32 1.0, %v2813_v28 }
 0xecd   : > { %2665 = vmatpush3.msra.mxu1 %v2167_v62 }
 0xece   : > { %2667 = vmatmul.mubr.msk.f32.vlgmr.msra.gmra.mrb[14].mxu1 %vm996_vm9, %v1918_v49  ;;  %2814 = vrcp.f32 %v2080_v58 }
 0xed8   : > { %v2815_v33 = vpop.eup %2814 }
 0xf27   : > { %v2170_v29 = vpop.permute.xlu0 %2169 }
 0xf28   : > { %v2172_v60 = vmul.f32 %v2815_v33, %v2170_v29 }
 0xfa1   : > { %v2242_v61 = vpop.f32.mrb[14].mxu1 }
 0xfa2   : > { %v2246_v0 = vadd.f32 %v2242_v61, %v2172_v60  ;;  %v2668_v1 = vpop.f32.mrb[15].mxu1 }
 0xfa4   : > { %2816 = vtanh.f32 %v2246_v0  ;;  %v2261_v2 = vsel %vm3344_vm5, %v2246_v0, %v1869_v57 }
 0xfa5   : > { %2267 = vst.msk [vmem:[%s663_s27] sm:$0xff] %vm741_vm1, %v2261_v2 }
 0xfae   : > { %v2817_v3 = vpop.eup %2816 }
 0xfaf   : > { %2249 = vrot.lane.b32.xlu0 %v2817_v3, %s3423_s14 }
 0xfb0   : > { %2831 = shalt.err (!%p2828_p7)
}
 0xfb1   : > { %s2832_s13 = scalar_lea.hbm %s3356_s22, 128  ;;  %s2836_s27 = scalar_lea.hbm %s3412_s9, 256 }
 0xfb2   : > { %p2833_p10 = scmp.ne.s32.totalorder %s3356_s22, %s2832_s13  ;;  %p2837_p13 = scmp.lt.u32.totalorder %s3356_s22, %s3412_s9 }
 0xfb3   : > { %p2838_p0 = scmp.lt.u32.totalorder %s2836_s27, %s2832_s13  ;;  %p2840_p2 = scmp.lt.u32.totalorder %s2832_s13, %s3356_s22 }
 0xfb4   : > { %p2834_p11 = pnand %p2833_p10, %p2982_p6 }
 0xfb5   : > { %p2839_p1 = por %p2838_p0, %p2837_p13 }
 0xfb6   : > { %p2835_p12 = pneg %p2834_p11 }
 0xfb7   : > { %p2841_p3 = por %p2840_p2, %p2839_p1 }
 0xfb9   : > { %p2842_p4 = pnand %p2841_p3, %p2835_p12 }
 0xfbb   : > { %2845 = shalt.err (!%p2842_p4)
}
 0xfbc   : > { %2725 = dma.vmem_to_hbm [thread:$0]  (%p2982_p6), %s2290_s29, 128, %s3356_s22, %s2273_s23  }
 0xfbd   : > { %s3432_s1 = smov 96   ;;  %s675_s26 = scalar_lea.vmem %s3411_s8, %s3097_s16 }
0x1021   : > { %v2250_v42 = vpop.permute.xlu0 %2249 }
0x1022   : > { %v2252_v4 = vmul.f32 %v2815_v33, %v2250_v42 }
0x1024   : > { %v2260_v5 = vsel %vm3344_vm5, %v2252_v4, %v3300_v16 }
0x1025   : > { %2263 = vrot.lane.b32.xlu0 %v2260_v5, %s3432_s1 }
0x1097   : > { %v2264_v7 = vpop.permute.xlu0 %2263 }
0x1098   : > { %2266 = vst.msk [vmem:[%s675_s26] sm:$0xff] %vm741_vm1, %v2264_v7 }
0x1099 PF: > { %s2308_s20 = sand.u32 1, %s2868_s30   ;;  %p2728_p6 = pnand %p2471_p9, %p2986_p8 }
0x109a   : > { %s2309_s29 = scalar_lea.sflag [#allocation8], %s2308_s20 }
0x109b   : > { %2863 = dma.done.wait (!%p2728_p6), %s2309_s29, 128  }
0x109c   : > { %2865 = vsyncadd (!%p2728_p6), %s2309_s29, 4294967168  ;;  %p20_p5 = scmp.ge.s32.totalorder %s2964_s15, 4   ;;  %s3433_s30 = smov %s2872_s10 }
0x109d   : > { %s3434_s10 = smov %s2876_s11  ;;  %s3435_s11 = smov %s2976_s18 }
0x109e   : > { %s3436_s12 = smov %s2964_s15  ;;  %22 = sbr.rel (!%p20_p5) target bundleno = 6 (0x6), region = 327 }
0x10a5   :  { %2314 = vsyncpa [#allocation8], 1 }
0x10a6   :  { %2316 = vsyncpa [#allocation8 + $0x1], 1 }

</bundles_post_ra>
